<compile_context>
chip_gen: v5e
topology: v5e:2x2
jax: 0.10.0
libtpu: 0.0.40
codegen_flags: <defaults>
</compile_context>

<pallas_src>
import functools

import jax
import jax.numpy as jnp
from jax.experimental import pallas as pl
from jax.experimental.pallas import tpu as pltpu


def _round_up(x, m):
    return ((x + m - 1) // m) * m


def _causal_conv3d_kernel(*refs, t_tile, halo, kt_size, kh_size, kw_size,
                          dil_t, dil_h, dil_w, w_row, c_in_p, kp, kp_raw,
                          l_out):
    """One grid step = one (batch, t_tile output frames).

    refs (halo > 0):  xm, xh, w, b, o, im      (halo == 0: xm, w, b, o, im)
      xm : (t_tile, C_in_p, hw_ext)   main window of padded input frames
      xh : (halo,   C_in_p, hw_ext)   halo frames just past the main window
      w  : (C_out, KT*KP)             lane-dense im2col weight (resident)
      b  : (C_out, 1)                 bias (f32)
      o  : (t_tile, C_out, L_out)     output frames
      im : ((t_tile+halo)*KP, L_out)  im2col scratch (compute dtype)
    """
    if halo > 0:
        xm_ref, xh_ref, w_ref, b_ref, o_ref, im_ref = refs
    else:
        xm_ref, w_ref, b_ref, o_ref, im_ref = refs
        xh_ref = None
    c_out = o_ref.shape[1]
    pad_rows = kp - kp_raw
    if pad_rows:
        zpad = jnp.zeros((pad_rows, l_out), im_ref.dtype)   # hoisted once

    # Phase 1: build the spatial im2col scratch — one KP-row block per input
    # frame needed by this step (static unroll; t_tile is capped small).
    for f in range(t_tile + halo):
        src, fl = (xm_ref, f) if f < t_tile else (xh_ref, f - t_tile)
        for kh in range(kh_size):
            for kw in range(kw_size):
                off = kh * dil_h * w_row + kw * dil_w          # static offset
                row = f * kp + (kh * kw_size + kw) * c_in_p    # static, %8==0
                im_ref[pl.ds(row, c_in_p), :] = src[fl, :, pl.ds(off, l_out)]
        if pad_rows:   # alignment filler rows (paired with zero weight rows)
            im_ref[pl.ds(f * kp + kp_raw, pad_rows), :] = zpad

    # Phase 2: one (or KT) MXU dot(s) per output frame, f32 accumulation.
    bias_b = jnp.broadcast_to(b_ref[...], (c_out, l_out))       # hoisted once
    if dil_t == 1:
        w_all = w_ref[...]                                       # (C_out, KT*KP)
    for i in range(t_tile):
        if dil_t == 1:
            blk = im_ref[pl.ds(i * kp, kt_size * kp), :]         # (KT*KP, L)
            acc = jnp.dot(w_all, blk, preferred_element_type=jnp.float32)
        else:
            acc = None
            for kt in range(kt_size):
                blk = im_ref[pl.ds((i + kt * dil_t) * kp, kp), :]
                p = jnp.dot(w_ref[:, pl.ds(kt * kp, kp)], blk,
                            preferred_element_type=jnp.float32)
                acc = p if acc is None else acc + p
        o_ref[i] = (acc + bias_b).astype(o_ref.dtype)


def causal_conv3d(x, weight, bias, *, kernel_size, dilation=(1, 1, 1),
                  stride=(1, 1, 1), compute_dtype=jnp.bfloat16):
    """x: (B, C_in, T, H, W) NCDHW.  weight: (C_out, C_in, KT, KH, KW)."""
    # TODO(synk): only stride=(1,1,1), pad_mode='constant' (the module defaults).
    assert stride == (1, 1, 1), "kernel implements the default stride (1,1,1)"
    B, C_in, T, H, W = x.shape
    C_out = weight.shape[0]
    KT, KH, KW = kernel_size
    dT, dH, dW = dilation

    halo = (KT - 1) * dT                       # causal (front-only) time pad
    h_pad = (KH - 1) // 2
    w_pad = (KW - 1) // 2
    H_p, W_p = H + 2 * h_pad, W + 2 * w_pad
    T_out = T
    H_out = H_p - (KH - 1) * dH
    W_out = W_p - (KW - 1) * dW

    out_dtype = x.dtype
    in_isz = jnp.finfo(compute_dtype).bits // 8
    out_isz = jnp.finfo(out_dtype).bits // 8

    C_in_p = _round_up(C_in, 8)                # sublane-aligned channel block
    sub_pack = 32 // in_isz                    # rows per packed (.,128) tile
    KP_raw = KH * KW * C_in_p                  # real im2col rows per frame
    KP = _round_up(KP_raw, sub_pack)           # aligned rows per frame block
    L_valid = H_out * W_p                      # lanes carrying outputs (+wrap)
    L_out = _round_up(L_valid, 128)            # unmasked full-width stores
    max_off = (KH - 1) * dH * W_p + (KW - 1) * dW
    hw_ext = max_off + L_out                   # input lanes per frame

    # ---- input prep: bf16 cast, NCDHW -> (B,T,C,HW), pads, lane flatten ----
    x_t = jnp.transpose(x.astype(compute_dtype), (0, 2, 1, 3, 4))
    x_p = jnp.pad(x_t, ((0, 0), (halo, 0), (0, C_in_p - C_in),
                        (h_pad, h_pad), (w_pad, w_pad)))
    x_flat = x_p.reshape(B, T_out + halo, C_in_p, H_p * W_p)
    x_flat = jnp.pad(x_flat, ((0, 0), (0, 0), (0, 0),
                              (0, hw_ext - H_p * W_p)))

    # ---- weight: (C_out,C_in,KT,KH,KW) -> lane-dense (C_out, KT*KP) --------
    w_p = jnp.pad(weight, ((0, 0), (0, C_in_p - C_in), (0, 0), (0, 0), (0, 0)))
    w_r = jnp.transpose(w_p, (0, 2, 3, 4, 1)).reshape(C_out, KT, KP_raw)
    w_r = jnp.pad(w_r, ((0, 0), (0, 0), (0, KP - KP_raw)))
    w_flat = w_r.reshape(C_out, KT * KP).astype(compute_dtype)
    b2 = bias.reshape(C_out, 1).astype(jnp.float32)

    # ---- VMEM-aware time-tile selection ------------------------------------
    def _vmem_bytes(t):
        b_in = 2 * (t + halo) * C_in_p * hw_ext * in_isz     # dbl-buffered in
        b_out = 2 * t * C_out * L_out * out_isz              # dbl-buffered out
        b_scr = (t + halo) * KP * L_out * in_isz             # im2col scratch
        b_w = 2 * (C_out * KT * KP * in_isz + C_out * 4)     # weight + bias
        return b_in + b_out + b_scr + b_w

    try:
        vmem_cap = int(pltpu.get_tpu_info().vmem_capacity_bytes)
    except Exception:                          # conservative (v7x = 64 MiB)
        vmem_cap = 64 * 1024 * 1024
    num_cores = 2                              # v7x: 2 TCs; harmless elsewhere
    budget = int(0.6 * vmem_cap)

    base = halo if halo > 0 else 1
    MAX_TILE = 16                              # bound the static unroll
    upper = max(base, min(_round_up(T_out, base), MAX_TILE))
    cands = [t for t in range(base, upper + 1, base)
             if _vmem_bytes(t) <= budget]
    if not cands:
        cands = [base]

    def _steps(t):
        return B * (-(-T_out // t))
    eff_target = min(4 * num_cores, _steps(cands[0]))
    fitting = [t for t in cands if _steps(t) >= eff_target]
    t_tile = max(fitting) if fitting else cands[0]

    T_out_p = _round_up(T_out, t_tile)
    if T_out_p > T_out:                        # tail frames computed & dropped
        x_flat = jnp.pad(x_flat, ((0, 0), (0, T_out_p - T_out),
                                  (0, 0), (0, 0)))

    grid = (B, T_out_p // t_tile)

    kernel = functools.partial(
        _causal_conv3d_kernel,
        t_tile=t_tile, halo=halo, kt_size=KT, kh_size=KH, kw_size=KW,
        dil_t=dT, dil_h=dH, dil_w=dW, w_row=W_p, c_in_p=C_in_p, kp=KP,
        kp_raw=KP_raw, l_out=L_out)

    in_specs = [pl.BlockSpec((None, t_tile, C_in_p, hw_ext),
                             lambda b, t: (b, t, 0, 0))]
    operands = [x_flat]
    if halo > 0:
        ratio = t_tile // halo                 # t_tile is a multiple of halo
        in_specs.append(pl.BlockSpec((None, halo, C_in_p, hw_ext),
                                     lambda b, t: (b, (t + 1) * ratio, 0, 0)))
        operands.append(x_flat)                # 2nd view of the same array
    in_specs += [pl.BlockSpec((C_out, KT * KP), lambda b, t: (0, 0)),
                 pl.BlockSpec((C_out, 1), lambda b, t: (0, 0))]
    operands += [w_flat, b2]

    out_flat = pl.pallas_call(
        kernel,
        out_shape=jax.ShapeDtypeStruct((B, T_out_p, C_out, L_out), out_dtype),
        grid_spec=pltpu.PrefetchScalarGridSpec(
            num_scalar_prefetch=0,
            grid=grid,
            in_specs=in_specs,
            out_specs=pl.BlockSpec((None, t_tile, C_out, L_out),
                                   lambda b, t: (b, t, 0, 0)),
            scratch_shapes=[pltpu.VMEM(((t_tile + halo) * KP, L_out),
                                       compute_dtype)]),
        compiler_params=pltpu.CompilerParams(
            dimension_semantics=("parallel", "parallel"),
            vmem_limit_bytes=int(min(0.9 * vmem_cap,
                                     max(1.5 * _vmem_bytes(t_tile),
                                         32 * 1024 * 1024)))),
    )(*operands)

    # (B, T_out_p, C_out, L_out) -> drop padded frames / wrap & pad lanes.
    out = out_flat[:, :T_out, :, :L_valid].reshape(B, T_out, C_out, H_out, W_p)
    out = out[..., :W_out]
    return jnp.transpose(out, (0, 2, 1, 3, 4))


def _reference(x, weight, bias, *, kernel_size, dilation=(1, 1, 1)):
    """Plain-JAX reference matching the PyTorch module (for validation)."""
    KT, KH, KW = kernel_size
    dT, dH, dW = dilation
    time_pad = (KT - 1) * dT
    h_pad = (KH - 1) // 2
    w_pad = (KW - 1) // 2
    x_pad = jnp.pad(x, ((0, 0), (0, 0), (time_pad, 0),
                        (h_pad, h_pad), (w_pad, w_pad)))
    y = jax.lax.conv_general_dilated(
        x_pad, weight, window_strides=(1, 1, 1), padding="VALID",
        rhs_dilation=(dT, dH, dW),
        dimension_numbers=("NCDHW", "OIDHW", "NCDHW"),
        precision=jax.lax.Precision.HIGHEST)
    return y + bias[None, :, None, None, None]


if __name__ == "__main__":
    # Small shapes consistent with the module: B=2, C_in=4, C_out=8, T=8, H=W=16.
    B, C_in, C_out = 2, 4, 8
    T, H, W = 8, 16, 16
    kernel_size = (3, 3, 3)

    key = jax.random.PRNGKey(0)
    kx, kw, kb = jax.random.split(key, 3)
    x = jax.random.normal(kx, (B, C_in, T, H, W), dtype=jnp.float32)

    # Deterministic parameter init (PyTorch-style uniform(-1/sqrt(fan_in), ..)).
    fan_in = C_in * kernel_size[0] * kernel_size[1] * kernel_size[2]
    bound = 1.0 / (fan_in ** 0.5)
    weight = jax.random.uniform(kw, (C_out, C_in) + kernel_size,
                                minval=-bound, maxval=bound, dtype=jnp.float32)
    bias = jax.random.uniform(kb, (C_out,), minval=-bound, maxval=bound,
                              dtype=jnp.float32)

    out = causal_conv3d(x, weight, bias, kernel_size=kernel_size)
    out = jax.block_until_ready(out)

    # Reference at the kernel's compute precision (bf16 inputs, f32 accumulate):
    # isolates kernel correctness from the (intentional) bf16 cast.
    xq = x.astype(jnp.bfloat16).astype(jnp.float32)
    wq = weight.astype(jnp.bfloat16).astype(jnp.float32)
    ref = _reference(xq, wq, bias, kernel_size=kernel_size)

    assert out.shape == ref.shape == (B, C_out, T, H, W)
    assert jnp.allclose(out, ref, atol=2e-3, rtol=2e-3)

    print("KERNEL_OK")
</pallas_src>

<mosaic_0001>
module attributes {stable_mosaic.version = 11 : i64} {
  func.func @_causal_conv3d_kernel(%arg0: i32, %arg1: i32, %arg2: memref<1x2x8x422xbf16, #tpu.memory_space<vmem>>, %arg3: memref<1x2x8x422xbf16, #tpu.memory_space<vmem>>, %arg4: memref<8x240xbf16, #tpu.memory_space<vmem>>, %arg5: memref<8x1xf32, #tpu.memory_space<vmem>>, %arg6: memref<1x2x8x384xf32, #tpu.memory_space<vmem>>, %arg7: memref<320x384xbf16, #tpu.memory_space<vmem>>) attributes {dimension_semantics = [#tpu.dimension_semantics<parallel>, #tpu.dimension_semantics<parallel>], iteration_bounds = array<i64: 2, 4>, scalar_prefetch = 0 : i64, scratch_operands = 1 : i64, tpu.core_type = #tpu.core_type<tc>, window_params = [{transform_indices = @transform_0, window_bounds = array<i64: 1, 2, 8, 422>}, {transform_indices = @transform_1, window_bounds = array<i64: 1, 2, 8, 422>}, {pipeline_mode = #tpu.pipeline_mode<synchronous>, transform_indices = @transform_2, window_bounds = array<i64: 8, 240>}, {pipeline_mode = #tpu.pipeline_mode<synchronous>, transform_indices = @transform_3, window_bounds = array<i64: 8, 1>}, {transform_indices = @transform_4, window_bounds = array<i64: 1, 2, 8, 384>}]} {
    %cst = arith.constant 0.000000e+00 : bf16
    %0 = vector.broadcast %cst : bf16 to vector<8x384xbf16>
    %c0 = arith.constant 0 : index
    %c0_0 = arith.constant 0 : index
    %c0_1 = arith.constant 0 : index
    %c0_2 = arith.constant 0 : index
    %1 = vector.load %arg2[%c0, %c0_0, %c0_1, %c0_2] : memref<1x2x8x422xbf16, #tpu.memory_space<vmem>>, vector<1x1x8x384xbf16>
    %2 = vector.shape_cast %1 : vector<1x1x8x384xbf16> to vector<8x384xbf16>
    %c0_3 = arith.constant 0 : index
    %c0_4 = arith.constant 0 : index
    %3 = vector.load %arg7[%c0_3, %c0_4] : memref<320x384xbf16, #tpu.memory_space<vmem>>, vector<8x384xbf16>
    tpu.vector_store %arg7[%c0_3, %c0_4], %2 {strides = array<i32>} : memref<320x384xbf16, #tpu.memory_space<vmem>>, vector<8x384xbf16>,
    %c0_5 = arith.constant 0 : index
    %c0_6 = arith.constant 0 : index
    %c0_7 = arith.constant 0 : index
    %c1 = arith.constant 1 : index
    %4 = vector.load %arg2[%c0_5, %c0_6, %c0_7, %c1] : memref<1x2x8x422xbf16, #tpu.memory_space<vmem>>, vector<1x1x8x384xbf16>
    %5 = vector.shape_cast %4 : vector<1x1x8x384xbf16> to vector<8x384xbf16>
    %c8 = arith.constant 8 : index
    %c0_8 = arith.constant 0 : index
    %6 = vector.load %arg7[%c8, %c0_8] : memref<320x384xbf16, #tpu.memory_space<vmem>>, vector<8x384xbf16>
    tpu.vector_store %arg7[%c8, %c0_8], %5 {strides = array<i32>} : memref<320x384xbf16, #tpu.memory_space<vmem>>, vector<8x384xbf16>,
    %c0_9 = arith.constant 0 : index
    %c0_10 = arith.constant 0 : index
    %c0_11 = arith.constant 0 : index
    %c2 = arith.constant 2 : index
    %7 = vector.load %arg2[%c0_9, %c0_10, %c0_11, %c2] : memref<1x2x8x422xbf16, #tpu.memory_space<vmem>>, vector<1x1x8x384xbf16>
    %8 = vector.shape_cast %7 : vector<1x1x8x384xbf16> to vector<8x384xbf16>
    %c16 = arith.constant 16 : index
    %c0_12 = arith.constant 0 : index
    %9 = vector.load %arg7[%c16, %c0_12] : memref<320x384xbf16, #tpu.memory_space<vmem>>, vector<8x384xbf16>
    tpu.vector_store %arg7[%c16, %c0_12], %8 {strides = array<i32>} : memref<320x384xbf16, #tpu.memory_space<vmem>>, vector<8x384xbf16>,
    %c0_13 = arith.constant 0 : index
    %c0_14 = arith.constant 0 : index
    %c0_15 = arith.constant 0 : index
    %c18 = arith.constant 18 : index
    %10 = vector.load %arg2[%c0_13, %c0_14, %c0_15, %c18] : memref<1x2x8x422xbf16, #tpu.memory_space<vmem>>, vector<1x1x8x384xbf16>
    %11 = vector.shape_cast %10 : vector<1x1x8x384xbf16> to vector<8x384xbf16>
    %c24 = arith.constant 24 : index
    %c0_16 = arith.constant 0 : index
    %12 = vector.load %arg7[%c24, %c0_16] : memref<320x384xbf16, #tpu.memory_space<vmem>>, vector<8x384xbf16>
    tpu.vector_store %arg7[%c24, %c0_16], %11 {strides = array<i32>} : memref<320x384xbf16, #tpu.memory_space<vmem>>, vector<8x384xbf16>,
    %c0_17 = arith.constant 0 : index
    %c0_18 = arith.constant 0 : index
    %c0_19 = arith.constant 0 : index
    %c19 = arith.constant 19 : index
    %13 = vector.load %arg2[%c0_17, %c0_18, %c0_19, %c19] : memref<1x2x8x422xbf16, #tpu.memory_space<vmem>>, vector<1x1x8x384xbf16>
    %14 = vector.shape_cast %13 : vector<1x1x8x384xbf16> to vector<8x384xbf16>
    %c32 = arith.constant 32 : index
    %c0_20 = arith.constant 0 : index
    %15 = vector.load %arg7[%c32, %c0_20] : memref<320x384xbf16, #tpu.memory_space<vmem>>, vector<8x384xbf16>
    tpu.vector_store %arg7[%c32, %c0_20], %14 {strides = array<i32>} : memref<320x384xbf16, #tpu.memory_space<vmem>>, vector<8x384xbf16>,
    %c0_21 = arith.constant 0 : index
    %c0_22 = arith.constant 0 : index
    %c0_23 = arith.constant 0 : index
    %c20 = arith.constant 20 : index
    %16 = vector.load %arg2[%c0_21, %c0_22, %c0_23, %c20] : memref<1x2x8x422xbf16, #tpu.memory_space<vmem>>, vector<1x1x8x384xbf16>
    %17 = vector.shape_cast %16 : vector<1x1x8x384xbf16> to vector<8x384xbf16>
    %c40 = arith.constant 40 : index
    %c0_24 = arith.constant 0 : index
    %18 = vector.load %arg7[%c40, %c0_24] : memref<320x384xbf16, #tpu.memory_space<vmem>>, vector<8x384xbf16>
    tpu.vector_store %arg7[%c40, %c0_24], %17 {strides = array<i32>} : memref<320x384xbf16, #tpu.memory_space<vmem>>, vector<8x384xbf16>,
    %c0_25 = arith.constant 0 : index
    %c0_26 = arith.constant 0 : index
    %c0_27 = arith.constant 0 : index
    %c36 = arith.constant 36 : index
    %19 = vector.load %arg2[%c0_25, %c0_26, %c0_27, %c36] : memref<1x2x8x422xbf16, #tpu.memory_space<vmem>>, vector<1x1x8x384xbf16>
    %20 = vector.shape_cast %19 : vector<1x1x8x384xbf16> to vector<8x384xbf16>
    %c48 = arith.constant 48 : index
    %c0_28 = arith.constant 0 : index
    %21 = vector.load %arg7[%c48, %c0_28] : memref<320x384xbf16, #tpu.memory_space<vmem>>, vector<8x384xbf16>
    tpu.vector_store %arg7[%c48, %c0_28], %20 {strides = array<i32>} : memref<320x384xbf16, #tpu.memory_space<vmem>>, vector<8x384xbf16>,
    %c0_29 = arith.constant 0 : index
    %c0_30 = arith.constant 0 : index
    %c0_31 = arith.constant 0 : index
    %c37 = arith.constant 37 : index
    %22 = vector.load %arg2[%c0_29, %c0_30, %c0_31, %c37] : memref<1x2x8x422xbf16, #tpu.memory_space<vmem>>, vector<1x1x8x384xbf16>
    %23 = vector.shape_cast %22 : vector<1x1x8x384xbf16> to vector<8x384xbf16>
    %c56 = arith.constant 56 : index
    %c0_32 = arith.constant 0 : index
    %24 = vector.load %arg7[%c56, %c0_32] : memref<320x384xbf16, #tpu.memory_space<vmem>>, vector<8x384xbf16>
    tpu.vector_store %arg7[%c56, %c0_32], %23 {strides = array<i32>} : memref<320x384xbf16, #tpu.memory_space<vmem>>, vector<8x384xbf16>,
    %c0_33 = arith.constant 0 : index
    %c0_34 = arith.constant 0 : index
    %c0_35 = arith.constant 0 : index
    %c38 = arith.constant 38 : index
    %25 = vector.load %arg2[%c0_33, %c0_34, %c0_35, %c38] : memref<1x2x8x422xbf16, #tpu.memory_space<vmem>>, vector<1x1x8x384xbf16>
    %26 = vector.shape_cast %25 : vector<1x1x8x384xbf16> to vector<8x384xbf16>
    %c64 = arith.constant 64 : index
    %c0_36 = arith.constant 0 : index
    %27 = vector.load %arg7[%c64, %c0_36] : memref<320x384xbf16, #tpu.memory_space<vmem>>, vector<8x384xbf16>
    tpu.vector_store %arg7[%c64, %c0_36], %26 {strides = array<i32>} : memref<320x384xbf16, #tpu.memory_space<vmem>>, vector<8x384xbf16>,
    %c72 = arith.constant 72 : index
    %c0_37 = arith.constant 0 : index
    %28 = vector.load %arg7[%c72, %c0_37] : memref<320x384xbf16, #tpu.memory_space<vmem>>, vector<8x384xbf16>
    tpu.vector_store %arg7[%c72, %c0_37], %0 {strides = array<i32>} : memref<320x384xbf16, #tpu.memory_space<vmem>>, vector<8x384xbf16>,
    %c0_38 = arith.constant 0 : index
    %c1_39 = arith.constant 1 : index
    %c0_40 = arith.constant 0 : index
    %c0_41 = arith.constant 0 : index
    %29 = vector.load %arg2[%c0_38, %c1_39, %c0_40, %c0_41] : memref<1x2x8x422xbf16, #tpu.memory_space<vmem>>, vector<1x1x8x384xbf16>
    %30 = vector.shape_cast %29 : vector<1x1x8x384xbf16> to vector<8x384xbf16>
    %c80 = arith.constant 80 : index
    %c0_42 = arith.constant 0 : index
    %31 = vector.load %arg7[%c80, %c0_42] : memref<320x384xbf16, #tpu.memory_space<vmem>>, vector<8x384xbf16>
    tpu.vector_store %arg7[%c80, %c0_42], %30 {strides = array<i32>} : memref<320x384xbf16, #tpu.memory_space<vmem>>, vector<8x384xbf16>,
    %c0_43 = arith.constant 0 : index
    %c1_44 = arith.constant 1 : index
    %c0_45 = arith.constant 0 : index
    %c1_46 = arith.constant 1 : index
    %32 = vector.load %arg2[%c0_43, %c1_44, %c0_45, %c1_46] : memref<1x2x8x422xbf16, #tpu.memory_space<vmem>>, vector<1x1x8x384xbf16>
    %33 = vector.shape_cast %32 : vector<1x1x8x384xbf16> to vector<8x384xbf16>
    %c88 = arith.constant 88 : index
    %c0_47 = arith.constant 0 : index
    %34 = vector.load %arg7[%c88, %c0_47] : memref<320x384xbf16, #tpu.memory_space<vmem>>, vector<8x384xbf16>
    tpu.vector_store %arg7[%c88, %c0_47], %33 {strides = array<i32>} : memref<320x384xbf16, #tpu.memory_space<vmem>>, vector<8x384xbf16>,
    %c0_48 = arith.constant 0 : index
    %c1_49 = arith.constant 1 : index
    %c0_50 = arith.constant 0 : index
    %c2_51 = arith.constant 2 : index
    %35 = vector.load %arg2[%c0_48, %c1_49, %c0_50, %c2_51] : memref<1x2x8x422xbf16, #tpu.memory_space<vmem>>, vector<1x1x8x384xbf16>
    %36 = vector.shape_cast %35 : vector<1x1x8x384xbf16> to vector<8x384xbf16>
    %c96 = arith.constant 96 : index
    %c0_52 = arith.constant 0 : index
    %37 = vector.load %arg7[%c96, %c0_52] : memref<320x384xbf16, #tpu.memory_space<vmem>>, vector<8x384xbf16>
    tpu.vector_store %arg7[%c96, %c0_52], %36 {strides = array<i32>} : memref<320x384xbf16, #tpu.memory_space<vmem>>, vector<8x384xbf16>,
    %c0_53 = arith.constant 0 : index
    %c1_54 = arith.constant 1 : index
    %c0_55 = arith.constant 0 : index
    %c18_56 = arith.constant 18 : index
    %38 = vector.load %arg2[%c0_53, %c1_54, %c0_55, %c18_56] : memref<1x2x8x422xbf16, #tpu.memory_space<vmem>>, vector<1x1x8x384xbf16>
    %39 = vector.shape_cast %38 : vector<1x1x8x384xbf16> to vector<8x384xbf16>
    %c104 = arith.constant 104 : index
    %c0_57 = arith.constant 0 : index
    %40 = vector.load %arg7[%c104, %c0_57] : memref<320x384xbf16, #tpu.memory_space<vmem>>, vector<8x384xbf16>
    tpu.vector_store %arg7[%c104, %c0_57], %39 {strides = array<i32>} : memref<320x384xbf16, #tpu.memory_space<vmem>>, vector<8x384xbf16>,
    %c0_58 = arith.constant 0 : index
    %c1_59 = arith.constant 1 : index
    %c0_60 = arith.constant 0 : index
    %c19_61 = arith.constant 19 : index
    %41 = vector.load %arg2[%c0_58, %c1_59, %c0_60, %c19_61] : memref<1x2x8x422xbf16, #tpu.memory_space<vmem>>, vector<1x1x8x384xbf16>
    %42 = vector.shape_cast %41 : vector<1x1x8x384xbf16> to vector<8x384xbf16>
    %c112 = arith.constant 112 : index
    %c0_62 = arith.constant 0 : index
    %43 = vector.load %arg7[%c112, %c0_62] : memref<320x384xbf16, #tpu.memory_space<vmem>>, vector<8x384xbf16>
    tpu.vector_store %arg7[%c112, %c0_62], %42 {strides = array<i32>} : memref<320x384xbf16, #tpu.memory_space<vmem>>, vector<8x384xbf16>,
    %c0_63 = arith.constant 0 : index
    %c1_64 = arith.constant 1 : index
    %c0_65 = arith.constant 0 : index
    %c20_66 = arith.constant 20 : index
    %44 = vector.load %arg2[%c0_63, %c1_64, %c0_65, %c20_66] : memref<1x2x8x422xbf16, #tpu.memory_space<vmem>>, vector<1x1x8x384xbf16>
    %45 = vector.shape_cast %44 : vector<1x1x8x384xbf16> to vector<8x384xbf16>
    %c120 = arith.constant 120 : index
    %c0_67 = arith.constant 0 : index
    %46 = vector.load %arg7[%c120, %c0_67] : memref<320x384xbf16, #tpu.memory_space<vmem>>, vector<8x384xbf16>
    tpu.vector_store %arg7[%c120, %c0_67], %45 {strides = array<i32>} : memref<320x384xbf16, #tpu.memory_space<vmem>>, vector<8x384xbf16>,
    %c0_68 = arith.constant 0 : index
    %c1_69 = arith.constant 1 : index
    %c0_70 = arith.constant 0 : index
    %c36_71 = arith.constant 36 : index
    %47 = vector.load %arg2[%c0_68, %c1_69, %c0_70, %c36_71] : memref<1x2x8x422xbf16, #tpu.memory_space<vmem>>, vector<1x1x8x384xbf16>
    %48 = vector.shape_cast %47 : vector<1x1x8x384xbf16> to vector<8x384xbf16>
    %c128 = arith.constant 128 : index
    %c0_72 = arith.constant 0 : index
    %49 = vector.load %arg7[%c128, %c0_72] : memref<320x384xbf16, #tpu.memory_space<vmem>>, vector<8x384xbf16>
    tpu.vector_store %arg7[%c128, %c0_72], %48 {strides = array<i32>} : memref<320x384xbf16, #tpu.memory_space<vmem>>, vector<8x384xbf16>,
    %c0_73 = arith.constant 0 : index
    %c1_74 = arith.constant 1 : index
    %c0_75 = arith.constant 0 : index
    %c37_76 = arith.constant 37 : index
    %50 = vector.load %arg2[%c0_73, %c1_74, %c0_75, %c37_76] : memref<1x2x8x422xbf16, #tpu.memory_space<vmem>>, vector<1x1x8x384xbf16>
    %51 = vector.shape_cast %50 : vector<1x1x8x384xbf16> to vector<8x384xbf16>
    %c136 = arith.constant 136 : index
    %c0_77 = arith.constant 0 : index
    %52 = vector.load %arg7[%c136, %c0_77] : memref<320x384xbf16, #tpu.memory_space<vmem>>, vector<8x384xbf16>
    tpu.vector_store %arg7[%c136, %c0_77], %51 {strides = array<i32>} : memref<320x384xbf16, #tpu.memory_space<vmem>>, vector<8x384xbf16>,
    %c0_78 = arith.constant 0 : index
    %c1_79 = arith.constant 1 : index
    %c0_80 = arith.constant 0 : index
    %c38_81 = arith.constant 38 : index
    %53 = vector.load %arg2[%c0_78, %c1_79, %c0_80, %c38_81] : memref<1x2x8x422xbf16, #tpu.memory_space<vmem>>, vector<1x1x8x384xbf16>
    %54 = vector.shape_cast %53 : vector<1x1x8x384xbf16> to vector<8x384xbf16>
    %c144 = arith.constant 144 : index
    %c0_82 = arith.constant 0 : index
    %55 = vector.load %arg7[%c144, %c0_82] : memref<320x384xbf16, #tpu.memory_space<vmem>>, vector<8x384xbf16>
    tpu.vector_store %arg7[%c144, %c0_82], %54 {strides = array<i32>} : memref<320x384xbf16, #tpu.memory_space<vmem>>, vector<8x384xbf16>,
    %c152 = arith.constant 152 : index
    %c0_83 = arith.constant 0 : index
    %56 = vector.load %arg7[%c152, %c0_83] : memref<320x384xbf16, #tpu.memory_space<vmem>>, vector<8x384xbf16>
    tpu.vector_store %arg7[%c152, %c0_83], %0 {strides = array<i32>} : memref<320x384xbf16, #tpu.memory_space<vmem>>, vector<8x384xbf16>,
    %c0_84 = arith.constant 0 : index
    %c0_85 = arith.constant 0 : index
    %c0_86 = arith.constant 0 : index
    %c0_87 = arith.constant 0 : index
    %57 = vector.load %arg3[%c0_84, %c0_85, %c0_86, %c0_87] : memref<1x2x8x422xbf16, #tpu.memory_space<vmem>>, vector<1x1x8x384xbf16>
    %58 = vector.shape_cast %57 : vector<1x1x8x384xbf16> to vector<8x384xbf16>
    %c160 = arith.constant 160 : index
    %c0_88 = arith.constant 0 : index
    %59 = vector.load %arg7[%c160, %c0_88] : memref<320x384xbf16, #tpu.memory_space<vmem>>, vector<8x384xbf16>
    tpu.vector_store %arg7[%c160, %c0_88], %58 {strides = array<i32>} : memref<320x384xbf16, #tpu.memory_space<vmem>>, vector<8x384xbf16>,
    %c0_89 = arith.constant 0 : index
    %c0_90 = arith.constant 0 : index
    %c0_91 = arith.constant 0 : index
    %c1_92 = arith.constant 1 : index
    %60 = vector.load %arg3[%c0_89, %c0_90, %c0_91, %c1_92] : memref<1x2x8x422xbf16, #tpu.memory_space<vmem>>, vector<1x1x8x384xbf16>
    %61 = vector.shape_cast %60 : vector<1x1x8x384xbf16> to vector<8x384xbf16>
    %c168 = arith.constant 168 : index
    %c0_93 = arith.constant 0 : index
    %62 = vector.load %arg7[%c168, %c0_93] : memref<320x384xbf16, #tpu.memory_space<vmem>>, vector<8x384xbf16>
    tpu.vector_store %arg7[%c168, %c0_93], %61 {strides = array<i32>} : memref<320x384xbf16, #tpu.memory_space<vmem>>, vector<8x384xbf16>,
    %c0_94 = arith.constant 0 : index
    %c0_95 = arith.constant 0 : index
    %c0_96 = arith.constant 0 : index
    %c2_97 = arith.constant 2 : index
    %63 = vector.load %arg3[%c0_94, %c0_95, %c0_96, %c2_97] : memref<1x2x8x422xbf16, #tpu.memory_space<vmem>>, vector<1x1x8x384xbf16>
    %64 = vector.shape_cast %63 : vector<1x1x8x384xbf16> to vector<8x384xbf16>
    %c176 = arith.constant 176 : index
    %c0_98 = arith.constant 0 : index
    %65 = vector.load %arg7[%c176, %c0_98] : memref<320x384xbf16, #tpu.memory_space<vmem>>, vector<8x384xbf16>
    tpu.vector_store %arg7[%c176, %c0_98], %64 {strides = array<i32>} : memref<320x384xbf16, #tpu.memory_space<vmem>>, vector<8x384xbf16>,
    %c0_99 = arith.constant 0 : index
    %c0_100 = arith.constant 0 : index
    %c0_101 = arith.constant 0 : index
    %c18_102 = arith.constant 18 : index
    %66 = vector.load %arg3[%c0_99, %c0_100, %c0_101, %c18_102] : memref<1x2x8x422xbf16, #tpu.memory_space<vmem>>, vector<1x1x8x384xbf16>
    %67 = vector.shape_cast %66 : vector<1x1x8x384xbf16> to vector<8x384xbf16>
    %c184 = arith.constant 184 : index
    %c0_103 = arith.constant 0 : index
    %68 = vector.load %arg7[%c184, %c0_103] : memref<320x384xbf16, #tpu.memory_space<vmem>>, vector<8x384xbf16>
    tpu.vector_store %arg7[%c184, %c0_103], %67 {strides = array<i32>} : memref<320x384xbf16, #tpu.memory_space<vmem>>, vector<8x384xbf16>,
    %c0_104 = arith.constant 0 : index
    %c0_105 = arith.constant 0 : index
    %c0_106 = arith.constant 0 : index
    %c19_107 = arith.constant 19 : index
    %69 = vector.load %arg3[%c0_104, %c0_105, %c0_106, %c19_107] : memref<1x2x8x422xbf16, #tpu.memory_space<vmem>>, vector<1x1x8x384xbf16>
    %70 = vector.shape_cast %69 : vector<1x1x8x384xbf16> to vector<8x384xbf16>
    %c192 = arith.constant 192 : index
    %c0_108 = arith.constant 0 : index
    %71 = vector.load %arg7[%c192, %c0_108] : memref<320x384xbf16, #tpu.memory_space<vmem>>, vector<8x384xbf16>
    tpu.vector_store %arg7[%c192, %c0_108], %70 {strides = array<i32>} : memref<320x384xbf16, #tpu.memory_space<vmem>>, vector<8x384xbf16>,
    %c0_109 = arith.constant 0 : index
    %c0_110 = arith.constant 0 : index
    %c0_111 = arith.constant 0 : index
    %c20_112 = arith.constant 20 : index
    %72 = vector.load %arg3[%c0_109, %c0_110, %c0_111, %c20_112] : memref<1x2x8x422xbf16, #tpu.memory_space<vmem>>, vector<1x1x8x384xbf16>
    %73 = vector.shape_cast %72 : vector<1x1x8x384xbf16> to vector<8x384xbf16>
    %c200 = arith.constant 200 : index
    %c0_113 = arith.constant 0 : index
    %74 = vector.load %arg7[%c200, %c0_113] : memref<320x384xbf16, #tpu.memory_space<vmem>>, vector<8x384xbf16>
    tpu.vector_store %arg7[%c200, %c0_113], %73 {strides = array<i32>} : memref<320x384xbf16, #tpu.memory_space<vmem>>, vector<8x384xbf16>,
    %c0_114 = arith.constant 0 : index
    %c0_115 = arith.constant 0 : index
    %c0_116 = arith.constant 0 : index
    %c36_117 = arith.constant 36 : index
    %75 = vector.load %arg3[%c0_114, %c0_115, %c0_116, %c36_117] : memref<1x2x8x422xbf16, #tpu.memory_space<vmem>>, vector<1x1x8x384xbf16>
    %76 = vector.shape_cast %75 : vector<1x1x8x384xbf16> to vector<8x384xbf16>
    %c208 = arith.constant 208 : index
    %c0_118 = arith.constant 0 : index
    %77 = vector.load %arg7[%c208, %c0_118] : memref<320x384xbf16, #tpu.memory_space<vmem>>, vector<8x384xbf16>
    tpu.vector_store %arg7[%c208, %c0_118], %76 {strides = array<i32>} : memref<320x384xbf16, #tpu.memory_space<vmem>>, vector<8x384xbf16>,
    %c0_119 = arith.constant 0 : index
    %c0_120 = arith.constant 0 : index
    %c0_121 = arith.constant 0 : index
    %c37_122 = arith.constant 37 : index
    %78 = vector.load %arg3[%c0_119, %c0_120, %c0_121, %c37_122] : memref<1x2x8x422xbf16, #tpu.memory_space<vmem>>, vector<1x1x8x384xbf16>
    %79 = vector.shape_cast %78 : vector<1x1x8x384xbf16> to vector<8x384xbf16>
    %c216 = arith.constant 216 : index
    %c0_123 = arith.constant 0 : index
    %80 = vector.load %arg7[%c216, %c0_123] : memref<320x384xbf16, #tpu.memory_space<vmem>>, vector<8x384xbf16>
    tpu.vector_store %arg7[%c216, %c0_123], %79 {strides = array<i32>} : memref<320x384xbf16, #tpu.memory_space<vmem>>, vector<8x384xbf16>,
    %c0_124 = arith.constant 0 : index
    %c0_125 = arith.constant 0 : index
    %c0_126 = arith.constant 0 : index
    %c38_127 = arith.constant 38 : index
    %81 = vector.load %arg3[%c0_124, %c0_125, %c0_126, %c38_127] : memref<1x2x8x422xbf16, #tpu.memory_space<vmem>>, vector<1x1x8x384xbf16>
    %82 = vector.shape_cast %81 : vector<1x1x8x384xbf16> to vector<8x384xbf16>
    %c224 = arith.constant 224 : index
    %c0_128 = arith.constant 0 : index
    %83 = vector.load %arg7[%c224, %c0_128] : memref<320x384xbf16, #tpu.memory_space<vmem>>, vector<8x384xbf16>
    tpu.vector_store %arg7[%c224, %c0_128], %82 {strides = array<i32>} : memref<320x384xbf16, #tpu.memory_space<vmem>>, vector<8x384xbf16>,
    %c232 = arith.constant 232 : index
    %c0_129 = arith.constant 0 : index
    %84 = vector.load %arg7[%c232, %c0_129] : memref<320x384xbf16, #tpu.memory_space<vmem>>, vector<8x384xbf16>
    tpu.vector_store %arg7[%c232, %c0_129], %0 {strides = array<i32>} : memref<320x384xbf16, #tpu.memory_space<vmem>>, vector<8x384xbf16>,
    %c0_130 = arith.constant 0 : index
    %c1_131 = arith.constant 1 : index
    %c0_132 = arith.constant 0 : index
    %c0_133 = arith.constant 0 : index
    %85 = vector.load %arg3[%c0_130, %c1_131, %c0_132, %c0_133] : memref<1x2x8x422xbf16, #tpu.memory_space<vmem>>, vector<1x1x8x384xbf16>
    %86 = vector.shape_cast %85 : vector<1x1x8x384xbf16> to vector<8x384xbf16>
    %c240 = arith.constant 240 : index
    %c0_134 = arith.constant 0 : index
    %87 = vector.load %arg7[%c240, %c0_134] : memref<320x384xbf16, #tpu.memory_space<vmem>>, vector<8x384xbf16>
    tpu.vector_store %arg7[%c240, %c0_134], %86 {strides = array<i32>} : memref<320x384xbf16, #tpu.memory_space<vmem>>, vector<8x384xbf16>,
    %c0_135 = arith.constant 0 : index
    %c1_136 = arith.constant 1 : index
    %c0_137 = arith.constant 0 : index
    %c1_138 = arith.constant 1 : index
    %88 = vector.load %arg3[%c0_135, %c1_136, %c0_137, %c1_138] : memref<1x2x8x422xbf16, #tpu.memory_space<vmem>>, vector<1x1x8x384xbf16>
    %89 = vector.shape_cast %88 : vector<1x1x8x384xbf16> to vector<8x384xbf16>
    %c248 = arith.constant 248 : index
    %c0_139 = arith.constant 0 : index
    %90 = vector.load %arg7[%c248, %c0_139] : memref<320x384xbf16, #tpu.memory_space<vmem>>, vector<8x384xbf16>
    tpu.vector_store %arg7[%c248, %c0_139], %89 {strides = array<i32>} : memref<320x384xbf16, #tpu.memory_space<vmem>>, vector<8x384xbf16>,
    %c0_140 = arith.constant 0 : index
    %c1_141 = arith.constant 1 : index
    %c0_142 = arith.constant 0 : index
    %c2_143 = arith.constant 2 : index
    %91 = vector.load %arg3[%c0_140, %c1_141, %c0_142, %c2_143] : memref<1x2x8x422xbf16, #tpu.memory_space<vmem>>, vector<1x1x8x384xbf16>
    %92 = vector.shape_cast %91 : vector<1x1x8x384xbf16> to vector<8x384xbf16>
    %c256 = arith.constant 256 : index
    %c0_144 = arith.constant 0 : index
    %93 = vector.load %arg7[%c256, %c0_144] : memref<320x384xbf16, #tpu.memory_space<vmem>>, vector<8x384xbf16>
    tpu.vector_store %arg7[%c256, %c0_144], %92 {strides = array<i32>} : memref<320x384xbf16, #tpu.memory_space<vmem>>, vector<8x384xbf16>,
    %c0_145 = arith.constant 0 : index
    %c1_146 = arith.constant 1 : index
    %c0_147 = arith.constant 0 : index
    %c18_148 = arith.constant 18 : index
    %94 = vector.load %arg3[%c0_145, %c1_146, %c0_147, %c18_148] : memref<1x2x8x422xbf16, #tpu.memory_space<vmem>>, vector<1x1x8x384xbf16>
    %95 = vector.shape_cast %94 : vector<1x1x8x384xbf16> to vector<8x384xbf16>
    %c264 = arith.constant 264 : index
    %c0_149 = arith.constant 0 : index
    %96 = vector.load %arg7[%c264, %c0_149] : memref<320x384xbf16, #tpu.memory_space<vmem>>, vector<8x384xbf16>
    tpu.vector_store %arg7[%c264, %c0_149], %95 {strides = array<i32>} : memref<320x384xbf16, #tpu.memory_space<vmem>>, vector<8x384xbf16>,
    %c0_150 = arith.constant 0 : index
    %c1_151 = arith.constant 1 : index
    %c0_152 = arith.constant 0 : index
    %c19_153 = arith.constant 19 : index
    %97 = vector.load %arg3[%c0_150, %c1_151, %c0_152, %c19_153] : memref<1x2x8x422xbf16, #tpu.memory_space<vmem>>, vector<1x1x8x384xbf16>
    %98 = vector.shape_cast %97 : vector<1x1x8x384xbf16> to vector<8x384xbf16>
    %c272 = arith.constant 272 : index
    %c0_154 = arith.constant 0 : index
    %99 = vector.load %arg7[%c272, %c0_154] : memref<320x384xbf16, #tpu.memory_space<vmem>>, vector<8x384xbf16>
    tpu.vector_store %arg7[%c272, %c0_154], %98 {strides = array<i32>} : memref<320x384xbf16, #tpu.memory_space<vmem>>, vector<8x384xbf16>,
    %c0_155 = arith.constant 0 : index
    %c1_156 = arith.constant 1 : index
    %c0_157 = arith.constant 0 : index
    %c20_158 = arith.constant 20 : index
    %100 = vector.load %arg3[%c0_155, %c1_156, %c0_157, %c20_158] : memref<1x2x8x422xbf16, #tpu.memory_space<vmem>>, vector<1x1x8x384xbf16>
    %101 = vector.shape_cast %100 : vector<1x1x8x384xbf16> to vector<8x384xbf16>
    %c280 = arith.constant 280 : index
    %c0_159 = arith.constant 0 : index
    %102 = vector.load %arg7[%c280, %c0_159] : memref<320x384xbf16, #tpu.memory_space<vmem>>, vector<8x384xbf16>
    tpu.vector_store %arg7[%c280, %c0_159], %101 {strides = array<i32>} : memref<320x384xbf16, #tpu.memory_space<vmem>>, vector<8x384xbf16>,
    %c0_160 = arith.constant 0 : index
    %c1_161 = arith.constant 1 : index
    %c0_162 = arith.constant 0 : index
    %c36_163 = arith.constant 36 : index
    %103 = vector.load %arg3[%c0_160, %c1_161, %c0_162, %c36_163] : memref<1x2x8x422xbf16, #tpu.memory_space<vmem>>, vector<1x1x8x384xbf16>
    %104 = vector.shape_cast %103 : vector<1x1x8x384xbf16> to vector<8x384xbf16>
    %c288 = arith.constant 288 : index
    %c0_164 = arith.constant 0 : index
    %105 = vector.load %arg7[%c288, %c0_164] : memref<320x384xbf16, #tpu.memory_space<vmem>>, vector<8x384xbf16>
    tpu.vector_store %arg7[%c288, %c0_164], %104 {strides = array<i32>} : memref<320x384xbf16, #tpu.memory_space<vmem>>, vector<8x384xbf16>,
    %c0_165 = arith.constant 0 : index
    %c1_166 = arith.constant 1 : index
    %c0_167 = arith.constant 0 : index
    %c37_168 = arith.constant 37 : index
    %106 = vector.load %arg3[%c0_165, %c1_166, %c0_167, %c37_168] : memref<1x2x8x422xbf16, #tpu.memory_space<vmem>>, vector<1x1x8x384xbf16>
    %107 = vector.shape_cast %106 : vector<1x1x8x384xbf16> to vector<8x384xbf16>
    %c296 = arith.constant 296 : index
    %c0_169 = arith.constant 0 : index
    %108 = vector.load %arg7[%c296, %c0_169] : memref<320x384xbf16, #tpu.memory_space<vmem>>, vector<8x384xbf16>
    tpu.vector_store %arg7[%c296, %c0_169], %107 {strides = array<i32>} : memref<320x384xbf16, #tpu.memory_space<vmem>>, vector<8x384xbf16>,
    %c0_170 = arith.constant 0 : index
    %c1_171 = arith.constant 1 : index
    %c0_172 = arith.constant 0 : index
    %c38_173 = arith.constant 38 : index
    %109 = vector.load %arg3[%c0_170, %c1_171, %c0_172, %c38_173] : memref<1x2x8x422xbf16, #tpu.memory_space<vmem>>, vector<1x1x8x384xbf16>
    %110 = vector.shape_cast %109 : vector<1x1x8x384xbf16> to vector<8x384xbf16>
    %c304 = arith.constant 304 : index
    %c0_174 = arith.constant 0 : index
    %111 = vector.load %arg7[%c304, %c0_174] : memref<320x384xbf16, #tpu.memory_space<vmem>>, vector<8x384xbf16>
    tpu.vector_store %arg7[%c304, %c0_174], %110 {strides = array<i32>} : memref<320x384xbf16, #tpu.memory_space<vmem>>, vector<8x384xbf16>,
    %c312 = arith.constant 312 : index
    %c0_175 = arith.constant 0 : index
    %112 = vector.load %arg7[%c312, %c0_175] : memref<320x384xbf16, #tpu.memory_space<vmem>>, vector<8x384xbf16>
    tpu.vector_store %arg7[%c312, %c0_175], %0 {strides = array<i32>} : memref<320x384xbf16, #tpu.memory_space<vmem>>, vector<8x384xbf16>,
    %c0_176 = arith.constant 0 : index
    %c0_177 = arith.constant 0 : index
    %113 = vector.load %arg5[%c0_176, %c0_177] : memref<8x1xf32, #tpu.memory_space<vmem>>, vector<8x1xf32>
    %114 = vector.shape_cast %113 : vector<8x1xf32> to vector<8x1xf32>
    %115 = vector.broadcast %114 : vector<8x1xf32> to vector<8x384xf32>
    %c0_178 = arith.constant 0 : index
    %c0_179 = arith.constant 0 : index
    %116 = vector.load %arg4[%c0_178, %c0_179] : memref<8x240xbf16, #tpu.memory_space<vmem>>, vector<8x240xbf16>
    %c0_180 = arith.constant 0 : index
    %c0_181 = arith.constant 0 : index
    %117 = vector.load %arg7[%c0_180, %c0_181] : memref<320x384xbf16, #tpu.memory_space<vmem>>, vector<240x384xbf16>
    %cst_182 = arith.constant dense<0.000000e+00> : vector<8x384xf32>
    %118 = tpu.matmul %116, %117, %cst_182 {dimension_numbers = #tpu.dot_dimension_numbers<[1], [0], [0], [1], [0, 0, 1, 1], [], []>} : vector<8x240xbf16>, vector<240x384xbf16>, vector<8x384xf32> -> vector<8x384xf32>
    %119 = arith.addf %118, %115 : vector<8x384xf32>
    %c0_183 = arith.constant 0 : index
    %c0_184 = arith.constant 0 : index
    %c0_185 = arith.constant 0 : index
    %c0_186 = arith.constant 0 : index
    %120 = vector.load %arg6[%c0_183, %c0_184, %c0_185, %c0_186] : memref<1x2x8x384xf32, #tpu.memory_space<vmem>>, vector<1x1x8x384xf32>
    %121 = vector.shape_cast %120 : vector<1x1x8x384xf32> to vector<8x384xf32>
    %122 = vector.shape_cast %119 : vector<8x384xf32> to vector<1x1x8x384xf32>
    tpu.vector_store %arg6[%c0_183, %c0_184, %c0_185, %c0_186], %122 {strides = array<i32>} : memref<1x2x8x384xf32, #tpu.memory_space<vmem>>, vector<1x1x8x384xf32>,
    %c80_187 = arith.constant 80 : index
    %c0_188 = arith.constant 0 : index
    %123 = vector.load %arg7[%c80_187, %c0_188] : memref<320x384xbf16, #tpu.memory_space<vmem>>, vector<240x384xbf16>
    %cst_189 = arith.constant dense<0.000000e+00> : vector<8x384xf32>
    %124 = tpu.matmul %116, %123, %cst_189 {dimension_numbers = #tpu.dot_dimension_numbers<[1], [0], [0], [1], [0, 0, 1, 1], [], []>} : vector<8x240xbf16>, vector<240x384xbf16>, vector<8x384xf32> -> vector<8x384xf32>
    %125 = arith.addf %124, %115 : vector<8x384xf32>
    %c0_190 = arith.constant 0 : index
    %c1_191 = arith.constant 1 : index
    %c0_192 = arith.constant 0 : index
    %c0_193 = arith.constant 0 : index
    %126 = vector.load %arg6[%c0_190, %c1_191, %c0_192, %c0_193] : memref<1x2x8x384xf32, #tpu.memory_space<vmem>>, vector<1x1x8x384xf32>
    %127 = vector.shape_cast %126 : vector<1x1x8x384xf32> to vector<8x384xf32>
    %128 = vector.shape_cast %125 : vector<8x384xf32> to vector<1x1x8x384xf32>
    tpu.vector_store %arg6[%c0_190, %c1_191, %c0_192, %c0_193], %128 {strides = array<i32>} : memref<1x2x8x384xf32, #tpu.memory_space<vmem>>, vector<1x1x8x384xf32>,
    return
  }
  func.func @transform_0(%arg0: i32, %arg1: i32) -> (i32, i32, i32, i32) {
    %c0_i32 = arith.constant 0 : i32
    %c0_i32_0 = arith.constant 0 : i32
    %c0_i32_1 = arith.constant 0 : i32
    return %arg0, %arg1, %c0_i32, %c0_i32_0 : i32, i32, i32, i32
  }
  func.func @transform_1(%arg0: i32, %arg1: i32) -> (i32, i32, i32, i32) {
    %c1_i32 = arith.constant 1 : i32
    %0 = arith.addi %arg1, %c1_i32 : i32
    %c1_i32_0 = arith.constant 1 : i32
    %1 = arith.muli %0, %c1_i32_0 : i32
    %c0_i32 = arith.constant 0 : i32
    %c0_i32_1 = arith.constant 0 : i32
    %c0_i32_2 = arith.constant 0 : i32
    return %arg0, %1, %c0_i32, %c0_i32_1 : i32, i32, i32, i32
  }
  func.func @transform_2(%arg0: i32, %arg1: i32) -> (i32, i32) {
    %c0_i32 = arith.constant 0 : i32
    %c0_i32_0 = arith.constant 0 : i32
    %c0_i32_1 = arith.constant 0 : i32
    return %c0_i32, %c0_i32_0 : i32, i32
  }
  func.func @transform_3(%arg0: i32, %arg1: i32) -> (i32, i32) {
    %c0_i32 = arith.constant 0 : i32
    %c0_i32_0 = arith.constant 0 : i32
    %c0_i32_1 = arith.constant 0 : i32
    return %c0_i32, %c0_i32_0 : i32, i32
  }
  func.func @transform_4(%arg0: i32, %arg1: i32) -> (i32, i32, i32, i32) {
    %c0_i32 = arith.constant 0 : i32
    %c0_i32_0 = arith.constant 0 : i32
    %c0_i32_1 = arith.constant 0 : i32
    return %arg0, %arg1, %c0_i32, %c0_i32_0 : i32, i32, i32, i32
  }
}

</mosaic_0001>

<bundles_post_ra>
// kernel: tpu_custom_call.1
= control target key start
LH: loop header
LB: loop body
LE: loop exit
PB: predicated region body
PF: predicated region fallthrough
CT: control target
= control target key end

     0   :  { %s3259_s0 = inlined_call_operand.hbm [shape: bf16[2,10,8,422], index: 0, kind: input, shape index: {}]   ;;  %s3260_s1 = inlined_call_operand.hbm [shape: bf16[2,10,8,422], index: 1, kind: input, shape index: {}]   ;;  %s3261_s2 = inlined_call_operand.vmem [shape: bf16[8,240], index: 2, kind: input, shape index: {}]   ;;  %s3262_s3 = inlined_call_operand.vmem [shape: f32[8,1], index: 3, kind: input, shape index: {}]   ;;  %s3263_s4 = inlined_call_operand.hbm [shape: f32[2,8,8,384], index: 4, kind: output, shape index: {}]  }
   0x1   :  { %3269 = sst [smem:[#allocation18_spill]] %s3263_s4 }
   0x2   :  { %9 = vsyncpa [#allocation4], 0 }
   0x3   :  { %11 = vsyncpa [#allocation4 + $0x1], 0 }
   0x4   :  { %12 = vsyncpa [#allocation7], 0 }
   0x5   :  { %14 = vsyncpa [#allocation7 + $0x1], 0 }
   0x6   :  { %15 = vsyncpa [#allocation5], 0 }
   0x7   :  { %17 = vsyncpa [#allocation5 + $0x1], 0  ;;  %s2654_s15 = smov 0   ;;  %s2656_s16 = smov 0  }
   0x8   :  { %s2658_s17 = smov 0   ;;  %s2660_s18 = smov 0  }
   0x9   :  { %s2662_s19 = smov 0   ;;  %s2664_s20 = smov 0  }
   0xa   :  { %s2666_s21 = smov 0   ;;  %s2668_s22 = smov 0  }
   0xb   :  { %s2670_s23 = smov 0   ;;  %s2672_s24 = smov 0  }
   0xc   :  { %s2674_s25 = smov 0  }
   0xd LB: > { %3270 = sst [smem:[#allocation12_spill]] %s2602_s22  ;;  %s1787_s26 = sadd.s32 4294967295, %s2614_s25   ;;  %s2614_s25 = sphi %s2674_s25, %s23_s25   ;;  %s2610_s24 = sphi %s2672_s24, %s3290_s24   ;;  %s2606_s23 = sphi %s2670_s23, %s3289_s23   ;;  %s2602_s22 = sphi %s2668_s22, %s3288_s22   ;;  %s2598_s21 = sphi %s2666_s21, %s3287_s21   ;;  %s2594_s20 = sphi %s2664_s20, %s3296_s20   ;;  %s2590_s19 = sphi %s2662_s19, %s3295_s19   ;;  %s2586_s18 = sphi %s2660_s18, %s3294_s18   ;;  %s2582_s17 = sphi %s2658_s17, %s3293_s17   ;;  %s2578_s16 = sphi %s2656_s16, %s3292_s16   ;;  %s2574_s15 = sphi %s2654_s15, %s3291_s15  }
   0xe   : > { %3271 = sst [smem:[#allocation13_spill]] %s2606_s23  ;;  %s1788_s27 = sadd.s32 4294967294, %s2614_s25  }
   0xf   : > { %3272 = sst [smem:[#allocation14_spill]] %s2610_s24  ;;  %s32_s28 = sadd.s32 1, %s2606_s23 }
  0x10   : > { %s35_s29 = sadd.s32 1, %s2610_s24  ;;  %p33_p0 = scmp.ge.s32.totalorder %s32_s28, 4 }
  0x11   : > { %s44_s30 = sadd.s32 1, %s2594_s20  ;;  %p51_p1 = scmp.ne.s32.totalorder %s2594_s20, %s2590_s19 }
  0x12   : > { %p52_p2 = scmp.eq.s32.totalorder %s2614_s25, 0  ;;  %s3298_s29 = smov (!%p33_p0, %s35_s29), %s2610_s24 }
  0x13   : > { %s2717_s5 = scalar_select %p33_p0, 0, %s32_s28  }
  0x14   : > { %p2727_p3 = por %p52_p2, %p51_p1  ;;  %p37_p4 = scmp.ge.s32.totalorder %s3298_s29, 2 }
  0x15   : > { %3273 = sst [smem:[#allocation15_spill]] %s2717_s5  ;;  %s40_s6 = ssub.s32 %s2606_s23, %s2717_s5 }
  0x16   : > { %p57_p5 = scmp.ne.s32.totalorder %s2590_s19, %s2586_s18  ;;  %p2733_p6 = scmp.eq.s32.totalorder %s1787_s26, 0 }
  0x17   : > { %s68_s9 = sadd.s32 1, %s2717_s5  ;;  %s3300_s29 = smov (%p37_p4, %s3298_s29), 0 }
  0x18   : > { %3276 = sst [smem:[#allocation16_spill]] %s3300_s29  ;;  %p2745_p7 = por %p2733_p6, %p57_p5 }
  0x19   : > { %s70_s11 = ssub.s32 %s32_s28, %s68_s9  ;;  %s39_s12 = ssub.s32 %s2610_s24, %s3300_s29 }
  0x1a   : > { %p155_p8 = scmp.eq.s32.totalorder %s1787_s26, 7  ;;  %s41_s13 = sor.u32 %s40_s6, %s39_s12 }
  0x1b   : > { %s71_s14 = sor.u32 %s70_s11, %s39_s12  ;;  %p42_p9 = scmp.eq.s32.totalorder %s41_s13, 0 }
  0x1c   : > { %p2751_p10 = scmp.eq.s32.totalorder %s71_s14, 0  ;;  %p2758_p11 = por %p155_p8, %p51_p1 }
  0x1d   : > { %p161_p12 = scmp.eq.s32.totalorder %s1788_s27, 7  ;;  %p2323_p0 = scmp.lt.s32.totalorder %s2614_s25, 8 }
  0x1e   : > { %s2763_s22 = scalar_select %p42_p9, %s2594_s20, %s44_s30  }
  0x1f   : > { %p2768_p13 = por %p161_p12, %p57_p5  ;;  %s187_s28 = sand.u32 1, %s2594_s20  }
  0x20   : > { %3280 = sst [smem:[#allocation17_spill]] %s2763_s22  ;;  %s1791_s6 = sshll.u32 %s187_s28, 5 }
  0x21   : > { %s2211_s9 = sshll.u32 %s2606_s23, 3  ;;  %s2302_s11 = smul.u32 40, %s2610_s24 }
  0x22   : > { %s191_s12 = scalar_lea.vmem [#allocation3], %s1791_s6  ;;  %p2313_p1 = pnand %p2323_p0, %p2727_p3 }
  0x23   : > { %s202_s13 = sshll.u32 %s191_s12, 4  ;;  %s197_s27 = sadd.s32 %s2302_s11, %s2211_s9  ;;  %s203_s13 = int_to_ptr.vmem [resolvable:$true] %s202_s13 }
  0x24   : > { %s1794_s30 = sshll.u32 %s197_s27, 2  ;;  %p1798_p4 = scmp.ge.s32.totalorder %s2614_s25, 1 }
  0x25   : > { %s199_s24 = scalar_lea.hbm %s3259_s0, %s1794_s30  ;;  %p236_p5 = scmp.lt.s32.totalorder %s2614_s25, 9 }
  0x26   : > { %s200_s6 = sshll.u32 %s199_s24, 4  ;;  %s188_s7 = scalar_lea.sflag [#allocation4], %s187_s28  ;;  %s201_s6 = int_to_ptr.hbm [resolvable:$true] %s200_s6 }
  0x27   : > { %s2616_s12 = smov 256   ;;  %s2617_s23 = smov 16  }
  0x28   : > { %2315 = dma.hbm_to_vmem [thread:$0]  (!%p2313_p1), %s201_s6, 512, %s203_s13, %s188_s7, %s2616_s12, %s2616_s12, %s2617_s23  }
  0x29   : > { %p2785_p3 = pnand %p1798_p4, %p236_p5  ;;  %s74_s9 = sadd.s32 1, %s2582_s17 }
  0x2a   : > { %s2793_s11 = scalar_select %p2751_p10, %s2582_s17, %s74_s9  }
  0x2b   : > { %p81_p8 = scmp.ne.s32.totalorder %s2582_s17, %s2578_s16  ;;  %p87_p9 = scmp.ne.s32.totalorder %s2578_s16, %s2574_s15 }
  0x2c   : > { %s212_s24 = sand.u32 1, %s2582_s17   ;;  %s1715_s14 = scalar_lea.hbm %s3260_s1, %s1794_s30 }
  0x2d   : > { %p2805_p12 = por %p87_p9, %p2733_p6  ;;  %p83_p1 = por %p81_p8, %p52_p2 }
  0x2e   : > { %s1795_s13 = sshll.u32 %s212_s24, 5  ;;  %s1716_s6 = scalar_lea.hbm %s1715_s14, 32 }
  0x2f   : > { %s226_s7 = sshll.u32 %s1716_s6, 4  ;;  %s216_s5 = scalar_lea.vmem [#allocation6], %s1795_s13  ;;  %s227_s7 = int_to_ptr.hbm [resolvable:$true] %s226_s7 }
  0x30   : > { %s228_s9 = sshll.u32 %s216_s5, 4  ;;  %p2316_p10 = pnand %p2323_p0, %p83_p1  ;;  %s229_s9 = int_to_ptr.vmem [resolvable:$true] %s228_s9 }
  0x31   : > { %s213_s15 = scalar_lea.sflag [#allocation7], %s212_s24  ;;  %240 = sbr.rel (%p2785_p3) target bundleno = 542 (0x21e), region = 36 }
  0x32   : > { %2318 = dma.hbm_to_vmem [thread:$0]  (!%p2316_p10), %s227_s7, 512, %s229_s9, %s213_s15, %s2616_s12, %s2616_s12, %s2617_s23  }
  0x33   : > { %s2816_s8 = sand.u32 (!%p2785_p3), 1, %s2590_s19  }
  0x34   : > { %s1799_s30 = sshll.u32 (!%p2785_p3), %s2816_s8, 5  ;;  %s243_s29 = scalar_lea.sflag (!%p2785_p3), [#allocation4], %s2816_s8 }
  0x35   : > { %s2820_s27 = scalar_lea.vmem (!%p2785_p3), [#allocation3], %s1799_s30 }
  0x36   : > { %2561 = dma.done.wait (%p2745_p7), %s243_s29, 512  }
  0x37   : > { %2563 = vsyncadd (%p2745_p7), %s243_s29, 4294966784  ;;  %s252_s23 = sand.u32 1, %s2578_s16  }
  0x38   : > { %s1800_s22 = sshll.u32 %s252_s23, 5  ;;  %s253_s12 = scalar_lea.sflag [#allocation7], %s252_s23 }
  0x39   : > { %s2827_s24 = scalar_lea.vmem [#allocation6], %s1800_s22 }
  0x3a   : > { %2565 = dma.done.wait (%p2805_p12), %s253_s12, 512  }
  0x3b   : > { %2567 = vsyncadd (%p2805_p12), %s253_s12, 4294966784  ;;  %v2834_v0 = vld [vmem:[%s2820_s27 + $0x10] sm:$0xff]  ;;  %s2618_s10 = smov 108   ;;  %s2619_s14 = smov 109   ;;  %v675_v1 = vld [vmem:[%s2827_s24] sm:$0xff]  ;;  %vm306_vm0 = vcmask 1043456  }
  0x3c   : > { %520 = vrot.lane.b32.xlu1 %v2834_v0, %s2618_s10  ;;  %503 = vrot.lane.b32.xlu0 %v2834_v0, %s2619_s14  ;;  %446 = vst [vmem:[#allocation2 + $0x78] sm:$0xff] %v2834_v0  ;;  %s2620_s28 = smov 126   ;;  %v2845_v2 = vld [vmem:[%s2820_s27 + $0x18] sm:$0xff]  ;;  %v2848_v3 = vld [vmem:[%s2820_s27] sm:$0xff]  ;;  %s2621_s13 = smov 110   ;;  %vm326_vm1 = vcmask 1031168  }
  0x3d   : > { %469 = vrot.lane.b32.xlu2 %v2834_v0, %s2620_s28  ;;  %588 = vst [vmem:[#allocation2 + $0xf0] sm:$0xff] %v675_v1  ;;  %s2622_s6 = smov 90   ;;  %v710_v4 = vld [vmem:[%s2827_s24 + $0x8] sm:$0xff]  ;;  %s2623_s7 = smov 127   ;;  %v2906_v7 = vld [vmem:[%s2827_s24 + $0x18] sm:$0xff]  ;;  %v2909_v8 = vld [vmem:[%s2827_s24 + $0x10] sm:$0xff] }
  0x3e   : > { %294 = vst [vmem:[#allocation2] sm:$0xff] %v2848_v3  ;;  %s2624_s5 = smov 92   ;;  %s2625_s9 = smov 91   ;;  %v2872_v5 = vld [vmem:[%s2820_s27 + $0x8] sm:$0xff]  ;;  %v2626_v16 = vmov 0   ;;  %vm308_vm2 = vcmask 1039360  }
  0x3f   : > { %726 = vst [vmem:[#allocation2 + $0x15c] sm:$0xff] %v2626_v16  ;;  %2426 = vset.pattern.permute.xlu1 %v2626_v16  ;;  %2427 = vset.pattern.permute.xlu0 %v2626_v16  ;;  %v1802_v22 = vld [vmem:[%s2820_s27 + $0x18] sm:$0xf]  ;;  %vm380_vm3 = vcmask 883712   ;;  %vm362_vm4 = vcmask 891904   ;;  %vm344_vm5 = vcmask 900096  }
  0x40   : > { %441 = vst [vmem:[#allocation2 + $0x6c] sm:$0xff] %v2626_v16  ;;  %vm434_vm6 = vcmask 736256   ;;  %vm398_vm7 = vcmask 752640   ;;  %vm416_vm8 = vcmask 744448   ;;  %vm1184_vm9 = vcmask 916480   ;;  %s2303_s23 = smul.u32 48, %s2816_s8 }
  0x41   : > { %442 = vst [vmem:[#allocation2 + $0x74] sm:$0xf] %v2626_v16  ;;  %s3284_s12 = sld [smem:[#allocation12_spill]] }
  0x42   : > { %584 = vst [vmem:[#allocation2 + $0xe4] sm:$0xff] %v2626_v16  ;;  %s3197_s22 = scalar_lea.vmem [#allocation8], %s2303_s23 }
  0x43   : > { %585 = vst [vmem:[#allocation2 + $0xec] sm:$0xf] %v2626_v16 }
  0x44   : > { %522 = vrot.lane.b32.xlu1 %v2845_v2, %s2618_s10  ;;  %505 = vrot.lane.b32.xlu0 %v2845_v2, %s2619_s14  ;;  %727 = vst [vmem:[#allocation2 + $0x164] sm:$0xf] %v2626_v16 }
  0x45   : > { %471 = vrot.lane.b32.xlu2 %v2845_v2, %s2620_s28  ;;  %869 = vst [vmem:[#allocation2 + $0x1d4] sm:$0xff] %v2626_v16 }
  0x46   : > { %870 = vst [vmem:[#allocation2 + $0x1dc] sm:$0xf] %v2626_v16 }
  0x47   : > { %447 = vst [vmem:[#allocation2 + $0x80] sm:$0xf] %v1802_v22 }
  0x4c   : > { %488 = vrot.lane.b32.xlu1 %v2845_v2, %s2621_s13  ;;  %486 = vrot.lane.b32.xlu0 %v2834_v0, %s2621_s13 }
  0x4d   : > { %713 = vrot.lane.b32.xlu2 %v675_v1, %s2622_s6 }
  0x54   : > { %715 = vrot.lane.b32.xlu0 %v710_v4, %s2622_s6  ;;  %452 = vrot.lane.b32.xlu1 %v2834_v0, %s2623_s7 }
  0x55   : > { %454 = vrot.lane.b32.xlu2 %v2845_v2, %s2623_s7 }
  0x5c   : > { %679 = vrot.lane.b32.xlu0 %v675_v1, %s2624_s5  ;;  %681 = vrot.lane.b32.xlu1 %v710_v4, %s2624_s5 }
  0x5d   : > { %696 = vrot.lane.b32.xlu2 %v675_v1, %s2625_s9 }
  0x64   : > { %698 = vrot.lane.b32.xlu0 %v710_v4, %s2625_s9  ;;  %427 = vrot.lane.b32.xlu1 %v2848_v3, %s2622_s6 }
  0x65   : > { %429 = vrot.lane.b32.xlu2 %v2872_v5, %s2622_s6 }
  0x6c   : > { %645 = vrot.lane.b32.xlu0 %v675_v1, %s2619_s14  ;;  %647 = vrot.lane.b32.xlu1 %v710_v4, %s2619_s14 }
  0x6d   : > { %662 = vrot.lane.b32.xlu2 %v675_v1, %s2618_s10 }
  0x74   : > { %664 = vrot.lane.b32.xlu0 %v710_v4, %s2618_s10  ;;  %391 = vrot.lane.b32.xlu1 %v2848_v3, %s2624_s5 }
  0x75   : > { %393 = vrot.lane.b32.xlu2 %v2872_v5, %s2624_s5 }
  0x7c   : > { %409 = vrot.lane.b32.xlu0 %v2848_v3, %s2625_s9  ;;  %411 = vrot.lane.b32.xlu1 %v2872_v5, %s2625_s9 }
  0x7d   : > { %611 = vrot.lane.b32.xlu2 %v675_v1, %s2620_s28 }
  0x84   : > { %613 = vrot.lane.b32.xlu0 %v710_v4, %s2620_s28  ;;  %628 = vrot.lane.b32.xlu1 %v675_v1, %s2621_s13 }
  0x85   : > { %630 = vrot.lane.b32.xlu2 %v710_v4, %s2621_s13 }
  0x8c   : > { %357 = vrot.lane.b32.xlu1 %v2872_v5, %s2619_s14  ;;  %355 = vrot.lane.b32.xlu0 %v2848_v3, %s2619_s14 }
  0x8d   : > { %373 = vrot.lane.b32.xlu2 %v2848_v3, %s2618_s10 }
  0x94   : > { %594 = vrot.lane.b32.xlu1 %v675_v1, %s2623_s7  ;;  %375 = vrot.lane.b32.xlu0 %v2872_v5, %s2618_s10 }
  0x95   : > { %596 = vrot.lane.b32.xlu2 %v710_v4, %s2623_s7 }
  0x97   : > { %v470_v6 = vpop.permute.xlu2 %469 }
  0x98   : > { %v473_v9 = vrot.slane %v470_v6, 4 }
  0x9c   : > { %858 = vrot.lane.b32.xlu1 %v2906_v7, %s2622_s6  ;;  %856 = vrot.lane.b32.xlu0 %v2909_v8, %s2622_s6 }
  0x9d   : > { %319 = vrot.lane.b32.xlu2 %v2848_v3, %s2620_s28 }
  0x9f   : > { %v472_v10 = vpop.permute.xlu2 %471 }
  0xa0   : > { %v474_v11 = vrot.slane %v472_v10, 4 }
  0xa2   : > { %v475_v12 = vsel %vm306_vm0, %v473_v9, %v474_v11  ;;  %v477_v13 = vsel %vm326_vm1, %v472_v10, %v474_v11 }
  0xa3   : > { %v476_v14 = vsel %vm326_vm1, %v470_v6, %v475_v12  ;;  %481 = vst [vmem:[#allocation2 + $0x98] sm:$0xf] %v477_v13  ;;  %v2255_v12 = vld [vmem:[#allocation2 + $0x158] sm:$0xf0]  ;;  %v2009_v13 = vld [vmem:[#allocation2 + $0x15c] sm:$0xf0] }
  0xa4   : > { %337 = vrot.lane.b32.xlu1 %v2848_v3, %s2621_s13  ;;  %321 = vrot.lane.b32.xlu0 %v2872_v5, %s2620_s28  ;;  %480 = vst [vmem:[#allocation2 + $0x90] sm:$0xff] %v476_v14 }
  0xa5   : > { %339 = vrot.lane.b32.xlu2 %v2872_v5, %s2621_s13 }
  0xa7   : > { %v2926_v15 = vpop.permute.xlu2 %713 }
  0xa8   : > { %v717_v52 = vrot.slane %v2926_v15, 4 }
  0xab   : > { %v1911_v61 = vld [vmem:[#allocation2 + $0x90] sm:$0xf]  ;;  %v2230_v62 = vld [vmem:[#allocation2 + $0x94] sm:$0xf] }
  0xac   : > { %573 = vrot.lane.b32.xlu1 %v2845_v2, %s2622_s6  ;;  %571 = vrot.lane.b32.xlu0 %v2834_v0, %s2622_s6 }
  0xad   : > { %822 = vrot.lane.b32.xlu2 %v2909_v8, %s2624_s5 }
  0xae   : > { %v521_v17 = vpop.permute.xlu1 %520  ;;  %v504_v18 = vpop.permute.xlu0 %503 }
  0xaf   : > { %v2934_v19 = vpop.permute.xlu2 %454  ;;  %v524_v25 = vrot.slane %v521_v17, 4  ;;  %v507_v26 = vrot.slane %v504_v18, 4 }
  0xb0   : > { %v457_v20 = vrot.slane %v2934_v19, 4 }
  0xb2   : > { %v460_v21 = vsel %vm308_vm2, %v2934_v19, %v457_v20 }
  0xb3   : > { %464 = vst [vmem:[#allocation2 + $0x8c] sm:$0xf] %v460_v21 }
  0xb4   : > { %839 = vrot.lane.b32.xlu1 %v2909_v8, %s2625_s9  ;;  %824 = vrot.lane.b32.xlu0 %v2906_v7, %s2624_s5 }
  0xb5   : > { %841 = vrot.lane.b32.xlu2 %v2906_v7, %s2625_s9 }
  0xb6   : > { %v523_v23 = vpop.permute.xlu1 %522  ;;  %v506_v24 = vpop.permute.xlu0 %505 }
  0xb7   : > { %v525_v27 = vrot.slane %v523_v23, 4  ;;  %v508_v28 = vrot.slane %v506_v24, 4  ;;  %v2948_v29 = vpop.permute.xlu2 %696 }
  0xb9   : > { %v526_v30 = vsel %vm306_vm0, %v524_v25, %v525_v27  ;;  %v528_v31 = vsel %vm380_vm3, %v523_v23, %v525_v27  ;;  %v509_v32 = vsel %vm306_vm0, %v507_v26, %v508_v28  ;;  %v511_v35 = vsel %vm362_vm4, %v506_v24, %v508_v28 }
  0xba   : > { %v527_v33 = vsel %vm380_vm3, %v521_v17, %v526_v30  ;;  %532 = vst [vmem:[#allocation2 + $0xbc] sm:$0xf] %v528_v31  ;;  %v510_v34 = vsel %vm362_vm4, %v504_v18, %v509_v32  ;;  %v1899_v17 = vld [vmem:[#allocation2 + $0x78] sm:$0xf]  ;;  %v2227_v18 = vld [vmem:[#allocation2 + $0x7c] sm:$0xf] }
  0xbb   : > { %531 = vst [vmem:[#allocation2 + $0xb4] sm:$0xff] %v527_v33  ;;  %v700_v30 = vrot.slane %v2948_v29, 4 }
  0xbc   : > { %514 = vst [vmem:[#allocation2 + $0xa8] sm:$0xff] %v510_v34  ;;  %302 = vrot.lane.b32.xlu1 %v2872_v5, %s2623_s7  ;;  %300 = vrot.lane.b32.xlu0 %v2848_v3, %s2623_s7 }
  0xbd   : > { %515 = vst [vmem:[#allocation2 + $0xb0] sm:$0xf] %v511_v35  ;;  %537 = vrot.lane.b32.xlu2 %v2834_v0, %s2624_s5 }
  0xbe   : > { %v489_v36 = vpop.permute.xlu1 %488  ;;  %v487_v37 = vpop.permute.xlu0 %486 }
  0xbf   : > { %v491_v38 = vrot.slane %v489_v36, 4  ;;  %v490_v39 = vrot.slane %v487_v37, 4  ;;  %v2962_v40 = vpop.permute.xlu2 %429 }
  0xc0   : > { %v432_v41 = vrot.slane %v2962_v40, 4 }
  0xc1   : > { %v494_v42 = vsel %vm344_vm5, %v489_v36, %v491_v38  ;;  %v492_v43 = vsel %vm306_vm0, %v490_v39, %v491_v38 }
  0xc2   : > { %498 = vst [vmem:[#allocation2 + $0xa4] sm:$0xf] %v494_v42  ;;  %v493_v44 = vsel %vm344_vm5, %v487_v37, %v492_v43  ;;  %v2234_v45 = vld [vmem:[#allocation2 + $0xb0] sm:$0xf0]  ;;  %v1925_v46 = vld [vmem:[#allocation2 + $0xb4] sm:$0xf0]  ;;  %v436_v47 = vsel %vm434_vm6, %v2962_v40, %v432_v41 }
  0xc3   : > { %497 = vst [vmem:[#allocation2 + $0x9c] sm:$0xff] %v493_v44  ;;  %v1923_v48 = vld [vmem:[#allocation2 + $0xa8] sm:$0xf]  ;;  %v2233_v49 = vld [vmem:[#allocation2 + $0xac] sm:$0xf] }
  0xc4   : > { %554 = vrot.lane.b32.xlu1 %v2834_v0, %s2625_s9  ;;  %539 = vrot.lane.b32.xlu0 %v2845_v2, %s2624_s5  ;;  %v1924_v50 = vor.u32 %v2234_v45, %v1923_v48  ;;  %v1928_v51 = vor.u32 %v2233_v49, %v1925_v46  ;;  %440 = vst [vmem:[#allocation2 + $0x68] sm:$0xf] %v436_v47 }
  0xc5   : > { %556 = vrot.lane.b32.xlu2 %v2845_v2, %s2625_s9  ;;  %s1667_s9 = sshll.u32 %s3197_s22, 4  ;;  %s1668_s9 = int_to_ptr.vmem [resolvable:$true] %s1667_s9 }
  0xc6   : > { %1188 = vmatpush.bf16.msra.mxu0 %v1924_v50  ;;  %1214 = vmatpush.bf16.msra.mxu2 %v1928_v51  ;;  %v716_v53 = vpop.permute.xlu0 %715  ;;  %v453_v54 = vpop.permute.xlu1 %452  ;;  %v1889_v51 = vld [vmem:[#allocation2 + $0x6c] sm:$0xf0] }
  0xc7   : > { %v718_v55 = vrot.slane %v716_v53, 4  ;;  %v456_v56 = vrot.slane %v453_v54, 4  ;;  %v2979_v57 = vpop.permute.xlu2 %662 }
  0xc9   : > { %v719_v58 = vsel %vm306_vm0, %v717_v52, %v718_v55  ;;  %v721_v59 = vsel %vm434_vm6, %v716_v53, %v718_v55  ;;  %v458_v60 = vsel %vm306_vm0, %v456_v56, %v457_v20 }
  0xca   : > { %v720_v63 = vsel %vm434_vm6, %v2926_v15, %v719_v58  ;;  %725 = vst [vmem:[#allocation2 + $0x158] sm:$0xf] %v721_v59  ;;  %v459_v0 = vsel %vm308_vm2, %v453_v54, %v458_v60  ;;  %v2231_v1 = vld [vmem:[#allocation2 + $0x98] sm:$0xf0]  ;;  %v1913_v2 = vld [vmem:[#allocation2 + $0x9c] sm:$0xf0] }
  0xcb   : > { %724 = vst [vmem:[#allocation2 + $0x150] sm:$0xff] %v720_v63  ;;  %v1912_v3 = vor.u32 %v2231_v1, %v1911_v61  ;;  %v1916_v4 = vor.u32 %v2230_v62, %v1913_v2  ;;  %v666_v62 = vrot.slane %v2979_v57, 4 }
  0xcc   : > { %463 = vst [vmem:[#allocation2 + $0x84] sm:$0xff] %v459_v0  ;;  %790 = vrot.lane.b32.xlu1 %v2906_v7, %s2619_s14  ;;  %788 = vrot.lane.b32.xlu0 %v2909_v8, %s2619_s14 }
  0xcd   : > { %1189 = vmatpush.bf16.msra.mxu0 %v1912_v3  ;;  %1215 = vmatpush.bf16.msra.mxu2 %v1916_v4 }
  0xce   : > { %v680_v5 = vpop.permute.xlu0 %679  ;;  %v682_v6 = vpop.permute.xlu1 %681  ;;  %805 = vrot.lane.b32.xlu2 %v2909_v8, %s2618_s10 }
  0xcf   : > { %v683_v9 = vrot.slane %v680_v5, 4  ;;  %v684_v10 = vrot.slane %v682_v6, 4  ;;  %v2995_v11 = vpop.permute.xlu2 %393 }
  0xd0   : > { %v396_v14 = vrot.slane %v2995_v11, 4 }
  0xd1   : > { %v685_v15 = vsel %vm306_vm0, %v683_v9, %v684_v10  ;;  %v687_v16 = vsel %vm398_vm7, %v682_v6, %v684_v10 }
  0xd2   : > { %v686_v19 = vsel %vm398_vm7, %v680_v5, %v685_v15  ;;  %691 = vst [vmem:[#allocation2 + $0x140] sm:$0xf] %v687_v16  ;;  %v2007_v20 = vld [vmem:[#allocation2 + $0x150] sm:$0xf]  ;;  %v2254_v21 = vld [vmem:[#allocation2 + $0x154] sm:$0xf]  ;;  %v400_v22 = vsel %vm398_vm7, %v2995_v11, %v396_v14 }
  0xd3   : > { %690 = vst [vmem:[#allocation2 + $0x138] sm:$0xff] %v686_v19  ;;  %v2008_v23 = vor.u32 %v2255_v12, %v2007_v20  ;;  %v2012_v24 = vor.u32 %v2254_v21, %v2009_v13  ;;  %v2228_v25 = vld [vmem:[#allocation2 + $0x80] sm:$0xf0]  ;;  %v1901_v26 = vld [vmem:[#allocation2 + $0x84] sm:$0xf0] }
  0xd4   : > { %754 = vrot.lane.b32.xlu1 %v2909_v8, %s2620_s28  ;;  %807 = vrot.lane.b32.xlu0 %v2906_v7, %s2618_s10  ;;  %v1900_v27 = vor.u32 %v2228_v25, %v1899_v17  ;;  %v1904_v28 = vor.u32 %v2227_v18, %v1901_v26  ;;  %404 = vst [vmem:[#allocation2 + $0x50] sm:$0xf] %v400_v22  ;;  %v587_v25 = vld [vmem:[%s2827_s24 + $0x8] sm:$0xf]  ;;  %s2305_s10 = smul.u32 24, %s3284_s12 }
  0xd5   : > { %1202 = vmatpush.bf16.msra.mxu1 %v2008_v23  ;;  %1228 = vmatpush.bf16.msra.mxu3 %v2012_v24  ;;  %589 = vst [vmem:[#allocation2 + $0xf8] sm:$0xf] %v587_v25 }
  0xd6   : > { %v699_v31 = vpop.permute.xlu0 %698  ;;  %1190 = vmatpush.bf16.msra.mxu0 %v1900_v27  ;;  %1216 = vmatpush.bf16.msra.mxu2 %v1904_v28  ;;  %v428_v32 = vpop.permute.xlu1 %427 }
  0xd7   : > { %v701_v33 = vrot.slane %v699_v31, 4  ;;  %v431_v34 = vrot.slane %v428_v32, 4  ;;  %756 = vrot.lane.b32.xlu2 %v2906_v7, %s2620_s28  ;;  %v3012_v35 = vpop.permute.xlu2 %611 }
  0xd8   : > { %v615_v26 = vrot.slane %v3012_v35, 4 }
  0xd9   : > { %v702_v36 = vsel %vm306_vm0, %v700_v30, %v701_v33  ;;  %v704_v37 = vsel %vm416_vm8, %v699_v31, %v701_v33  ;;  %v433_v38 = vsel %vm306_vm0, %v431_v34, %v432_v41 }
  0xda   : > { %v703_v39 = vsel %vm416_vm8, %v2948_v29, %v702_v36  ;;  %708 = vst [vmem:[#allocation2 + $0x14c] sm:$0xf] %v704_v37  ;;  %v435_v42 = vsel %vm434_vm6, %v428_v32, %v433_v38  ;;  %v2225_v29 = vld [vmem:[#allocation2 + $0x68] sm:$0xf0]  ;;  %v1995_v49 = vld [vmem:[#allocation2 + $0x138] sm:$0xf] }
  0xdb   : > { %707 = vst [vmem:[#allocation2 + $0x144] sm:$0xff] %v703_v39  ;;  %v2251_v50 = vld [vmem:[#allocation2 + $0x13c] sm:$0xf] }
  0xdc   : > { %439 = vst [vmem:[#allocation2 + $0x60] sm:$0xff] %v435_v42  ;;  %773 = vrot.lane.b32.xlu1 %v2906_v7, %s2621_s13  ;;  %771 = vrot.lane.b32.xlu0 %v2909_v8, %s2621_s13 }
  0xde   : > { %v646_v43 = vpop.permute.xlu0 %645  ;;  %v648_v44 = vpop.permute.xlu1 %647 }
  0xdf   : > { %v649_v45 = vrot.slane %v646_v43, 4  ;;  %v650_v40 = vrot.slane %v648_v44, 4  ;;  %v3026_v46 = vpop.permute.xlu2 %630  ;;  %737 = vrot.lane.b32.xlu2 %v2909_v8, %s2623_s7 }
  0xe0   : > { %v633_v41 = vrot.slane %v3026_v46, 4 }
  0xe1   : > { %v651_v47 = vsel %vm306_vm0, %v649_v45, %v650_v40  ;;  %v653_v48 = vsel %vm362_vm4, %v648_v44, %v650_v40 }
  0xe2   : > { %v652_v52 = vsel %vm362_vm4, %v646_v43, %v651_v47  ;;  %657 = vst [vmem:[#allocation2 + $0x128] sm:$0xf] %v653_v48  ;;  %v2252_v53 = vld [vmem:[#allocation2 + $0x140] sm:$0xf0]  ;;  %v1997_v54 = vld [vmem:[#allocation2 + $0x144] sm:$0xf0]  ;;  %v636_v8 = vsel %vm344_vm5, %v3026_v46, %v633_v41 }
  0xe3   : > { %656 = vst [vmem:[#allocation2 + $0x120] sm:$0xff] %v652_v52  ;;  %v1996_v55 = vor.u32 %v2252_v53, %v1995_v49  ;;  %v2000_v56 = vor.u32 %v2251_v50, %v1997_v54  ;;  %v1887_v58 = vld [vmem:[#allocation2 + $0x60] sm:$0xf]  ;;  %v2224_v59 = vld [vmem:[#allocation2 + $0x64] sm:$0xf] }
  0xe4   : > { %739 = vrot.lane.b32.xlu0 %v2906_v7, %s2623_s7  ;;  %v1888_v60 = vor.u32 %v2225_v29, %v1887_v58  ;;  %v1892_v61 = vor.u32 %v2224_v59, %v1889_v51  ;;  %640 = vst [vmem:[#allocation2 + $0x11c] sm:$0xf] %v636_v8  ;;  %s3285_s7 = sld [smem:[#allocation18_spill]] }
  0xe5   : > { %1203 = vmatpush.bf16.msra.mxu1 %v1996_v55  ;;  %1229 = vmatpush.bf16.msra.mxu3 %v2000_v56 }
  0xe6   : > { %v665_v63 = vpop.permute.xlu0 %664  ;;  %1191 = vmatpush.bf16.msra.mxu0 %v1888_v60  ;;  %1217 = vmatpush.bf16.msra.mxu2 %v1892_v61  ;;  %v392_v0 = vpop.permute.xlu1 %391 }
  0xe7   : > { %v667_v1 = vrot.slane %v665_v63, 4  ;;  %v395_v2 = vrot.slane %v392_v0, 4  ;;  %v3041_v3 = vpop.permute.xlu2 %373 }
  0xe8   : > { %v377_v59 = vrot.slane %v3041_v3, 4 }
  0xe9   : > { %v668_v4 = vsel %vm306_vm0, %v666_v62, %v667_v1  ;;  %v670_v5 = vsel %vm380_vm3, %v665_v63, %v667_v1  ;;  %v397_v7 = vsel %vm306_vm0, %v395_v2, %v396_v14 }
  0xea   : > { %v669_v6 = vsel %vm380_vm3, %v2979_v57, %v668_v4  ;;  %674 = vst [vmem:[#allocation2 + $0x134] sm:$0xf] %v670_v5  ;;  %v399_v9 = vsel %vm398_vm7, %v392_v0, %v397_v7  ;;  %v1983_v18 = vld [vmem:[#allocation2 + $0x120] sm:$0xf]  ;;  %v2248_v57 = vld [vmem:[#allocation2 + $0x124] sm:$0xf] }
  0xeb   : > { %673 = vst [vmem:[#allocation2 + $0x12c] sm:$0xff] %v669_v6  ;;  %s2508_s12 = scalar_lea.hbm %s3285_s7, 384 }
  0xec   : > { %403 = vst [vmem:[#allocation2 + $0x48] sm:$0xff] %v399_v9 }
  0xee   : > { %v410_v10 = vpop.permute.xlu0 %409  ;;  %v412_v12 = vpop.permute.xlu1 %411 }
  0xef   : > { %v413_v13 = vrot.slane %v410_v10, 4  ;;  %v414_v15 = vrot.slane %v412_v12, 4  ;;  %v3051_v16 = vpop.permute.xlu2 %596 }
  0xf0   : > { %v599_v17 = vrot.slane %v3051_v16, 4 }
  0xf1   : > { %v415_v11 = vsel %vm306_vm0, %v413_v13, %v414_v15  ;;  %v418_v14 = vsel %vm416_vm8, %v412_v12, %v414_v15  ;;  %v1959_v15 = vld [vmem:[#allocation2 + $0xf0] sm:$0xf] }
  0xf2   : > { %v417_v19 = vsel %vm416_vm8, %v410_v10, %v415_v11  ;;  %422 = vst [vmem:[#allocation2 + $0x5c] sm:$0xf] %v418_v14  ;;  %v2249_v20 = vld [vmem:[#allocation2 + $0x128] sm:$0xf0]  ;;  %v1985_v21 = vld [vmem:[#allocation2 + $0x12c] sm:$0xf0]  ;;  %v602_v22 = vsel %vm308_vm2, %v3051_v16, %v599_v17 }
  0xf3   : > { %421 = vst [vmem:[#allocation2 + $0x54] sm:$0xff] %v417_v19  ;;  %v1984_v23 = vor.u32 %v2249_v20, %v1983_v18  ;;  %v1988_v24 = vor.u32 %v2248_v57, %v1985_v21  ;;  %v1875_v37 = vld [vmem:[#allocation2 + $0x48] sm:$0xf]  ;;  %v2221_v38 = vld [vmem:[#allocation2 + $0x4c] sm:$0xf] }
  0xf4   : > { %606 = vst [vmem:[#allocation2 + $0x104] sm:$0xf] %v602_v22  ;;  %v2242_v16 = vld [vmem:[#allocation2 + $0xf4] sm:$0xf] }
  0xf5   : > { %1204 = vmatpush.bf16.msra.mxu1 %v1984_v23  ;;  %1230 = vmatpush.bf16.msra.mxu3 %v1988_v24 }
  0xf6   : > { %v614_v27 = vpop.permute.xlu0 %613  ;;  %v629_v28 = vpop.permute.xlu1 %628 }
  0xf7   : > { %v616_v30 = vrot.slane %v614_v27, 4  ;;  %v632_v31 = vrot.slane %v629_v28, 4  ;;  %v3063_v32 = vpop.permute.xlu2 %319 }
  0xf9   : > { %v617_v33 = vsel %vm306_vm0, %v615_v26, %v616_v30  ;;  %v619_v34 = vsel %vm326_vm1, %v614_v27, %v616_v30  ;;  %v634_v36 = vsel %vm306_vm0, %v632_v31, %v633_v41 }
  0xfa   : > { %v618_v39 = vsel %vm326_vm1, %v3012_v35, %v617_v33  ;;  %623 = vst [vmem:[#allocation2 + $0x110] sm:$0xf] %v619_v34  ;;  %v635_v42 = vsel %vm344_vm5, %v629_v28, %v634_v36  ;;  %v2222_v43 = vld [vmem:[#allocation2 + $0x50] sm:$0xf0]  ;;  %v1877_v44 = vld [vmem:[#allocation2 + $0x54] sm:$0xf0] }
  0xfb   : > { %622 = vst [vmem:[#allocation2 + $0x108] sm:$0xff] %v618_v39  ;;  %v1876_v45 = vor.u32 %v2222_v43, %v1875_v37  ;;  %v1880_v40 = vor.u32 %v2221_v38, %v1877_v44  ;;  %v323_v28 = vrot.slane %v3063_v32, 4  ;;  %v293_v33 = vld [vmem:[%s2820_s27 + $0x8] sm:$0xf] }
  0xfc   : > { %639 = vst [vmem:[#allocation2 + $0x114] sm:$0xff] %v635_v42 }
  0xfd   : > { %1192 = vmatpush.bf16.msra.mxu0 %v1876_v45  ;;  %1218 = vmatpush.bf16.msra.mxu2 %v1880_v40  ;;  %295 = vst [vmem:[#allocation2 + $0x8] sm:$0xf] %v293_v33 }
  0xfe   : > { %v358_v29 = vpop.permute.xlu1 %357  ;;  %v356_v46 = vpop.permute.xlu0 %355 }
  0xff   : > { %v360_v47 = vrot.slane %v358_v29, 4  ;;  %v359_v41 = vrot.slane %v356_v46, 4  ;;  %v3073_v48 = vpop.permute.xlu2 %339 }
 0x100   : > { %v342_v49 = vrot.slane %v3073_v48, 4 }
 0x101   : > { %v364_v35 = vsel %vm362_vm4, %v358_v29, %v360_v47  ;;  %v361_v50 = vsel %vm306_vm0, %v359_v41, %v360_v47 }
 0x102   : > { %368 = vst [vmem:[#allocation2 + $0x38] sm:$0xf] %v364_v35  ;;  %v363_v51 = vsel %vm362_vm4, %v356_v46, %v361_v50  ;;  %v1971_v52 = vld [vmem:[#allocation2 + $0x108] sm:$0xf]  ;;  %v2245_v53 = vld [vmem:[#allocation2 + $0x10c] sm:$0xf]  ;;  %v346_v54 = vsel %vm344_vm5, %v3073_v48, %v342_v49 }
 0x103   : > { %367 = vst [vmem:[#allocation2 + $0x30] sm:$0xff] %v363_v51  ;;  %v2246_v8 = vld [vmem:[#allocation2 + $0x110] sm:$0xf0]  ;;  %v1973_v55 = vld [vmem:[#allocation2 + $0x114] sm:$0xf0] }
 0x104   : > { %v1972_v56 = vor.u32 %v2246_v8, %v1971_v52  ;;  %v1976_v58 = vor.u32 %v2245_v53, %v1973_v55  ;;  %350 = vst [vmem:[#allocation2 + $0x2c] sm:$0xf] %v346_v54 }
 0x106   : > { %1205 = vmatpush.bf16.msra.mxu1 %v1972_v56  ;;  %1231 = vmatpush.bf16.msra.mxu3 %v1976_v58  ;;  %v595_v60 = vpop.permute.xlu1 %594  ;;  %v376_v61 = vpop.permute.xlu0 %375 }
 0x107   : > { %v598_v62 = vrot.slane %v595_v60, 4  ;;  %v378_v63 = vrot.slane %v376_v61, 4  ;;  %v3084_v0 = vpop.permute.xlu2 %822 }
 0x108   : > { %v826_v55 = vrot.slane %v3084_v0, 4 }
 0x109   : > { %v600_v1 = vsel %vm306_vm0, %v598_v62, %v599_v17  ;;  %v379_v2 = vsel %vm306_vm0, %v377_v59, %v378_v63  ;;  %v382_v4 = vsel %vm380_vm3, %v376_v61, %v378_v63  ;;  %v2240_v61 = vld [vmem:[#allocation2 + $0xe0] sm:$0xf0]  ;;  %v1949_v62 = vld [vmem:[#allocation2 + $0xe4] sm:$0xf0] }
 0x10a   : > { %v601_v5 = vsel %vm308_vm2, %v595_v60, %v600_v1  ;;  %v381_v7 = vsel %vm380_vm3, %v3041_v3, %v379_v2  ;;  %386 = vst [vmem:[#allocation2 + $0x44] sm:$0xf] %v382_v4  ;;  %v1863_v18 = vld [vmem:[#allocation2 + $0x30] sm:$0xf]  ;;  %v2218_v57 = vld [vmem:[#allocation2 + $0x34] sm:$0xf] }
 0x10b   : > { %605 = vst [vmem:[#allocation2 + $0xfc] sm:$0xff] %v601_v5 }
 0x10c   : > { %385 = vst [vmem:[#allocation2 + $0x3c] sm:$0xff] %v381_v7 }
 0x10e   : > { %v859_v6 = vpop.permute.xlu1 %858  ;;  %v857_v9 = vpop.permute.xlu0 %856 }
 0x10f   : > { %v861_v10 = vrot.slane %v859_v6, 4  ;;  %v860_v12 = vrot.slane %v857_v9, 4  ;;  %v3094_v13 = vpop.permute.xlu2 %841 }
 0x110   : > { %v844_v17 = vrot.slane %v3094_v13, 4 }
 0x111   : > { %v864_v11 = vsel %vm434_vm6, %v859_v6, %v861_v10  ;;  %v862_v14 = vsel %vm306_vm0, %v860_v12, %v861_v10 }
 0x112   : > { %868 = vst [vmem:[#allocation2 + $0x1d0] sm:$0xf] %v864_v11  ;;  %v863_v3 = vsel %vm434_vm6, %v857_v9, %v862_v14  ;;  %v2243_v19 = vld [vmem:[#allocation2 + $0xf8] sm:$0xf0]  ;;  %v1961_v20 = vld [vmem:[#allocation2 + $0xfc] sm:$0xf0]  ;;  %v847_v21 = vsel %vm416_vm8, %v3094_v13, %v844_v17 }
 0x113   : > { %867 = vst [vmem:[#allocation2 + $0x1c8] sm:$0xff] %v863_v3  ;;  %v2219_v22 = vld [vmem:[#allocation2 + $0x38] sm:$0xf0]  ;;  %v1865_v23 = vld [vmem:[#allocation2 + $0x3c] sm:$0xf0]  ;;  %v1960_v24 = vor.u32 %v2243_v19, %v1959_v15  ;;  %v1964_v25 = vor.u32 %v2242_v16, %v1961_v20 }
 0x114   : > { %v1864_v26 = vor.u32 %v2219_v22, %v1863_v18  ;;  %v1868_v27 = vor.u32 %v2218_v57, %v1865_v23  ;;  %851 = vst [vmem:[#allocation2 + $0x1c4] sm:$0xf] %v847_v21 }
 0x115   : > { %1206 = vmatpush.bf16.msra.mxu1 %v1960_v24  ;;  %1232 = vmatpush.bf16.msra.mxu3 %v1964_v25  ;;  %v1839_v24 = vld [vmem:[#allocation2] sm:$0xf]  ;;  %v2212_v25 = vld [vmem:[#allocation2 + $0x4] sm:$0xf] }
 0x116   : > { %1193 = vmatpush.bf16.msra.mxu0 %v1864_v26  ;;  %1219 = vmatpush.bf16.msra.mxu2 %v1868_v27  ;;  %v338_v30 = vpop.permute.xlu1 %337  ;;  %v322_v31 = vpop.permute.xlu0 %321  ;;  %v2279_v26 = vld [vmem:[#allocation2 + $0x128] sm:$0xf0] }
 0x117   : > { %v341_v34 = vrot.slane %v338_v30, 4  ;;  %v324_v36 = vrot.slane %v322_v31, 4  ;;  %v3106_v37 = vpop.permute.xlu2 %537 }
 0x118   : > { %v541_v19 = vrot.slane %v3106_v37, 4 }
 0x119   : > { %v325_v38 = vsel %vm306_vm0, %v323_v28, %v324_v36  ;;  %v328_v39 = vsel %vm326_vm1, %v322_v31, %v324_v36  ;;  %v343_v42 = vsel %vm306_vm0, %v341_v34, %v342_v49  ;;  %v2106_v31 = vld [vmem:[#allocation2 + $0x120] sm:$0xf]  ;;  %v2300_v34 = vld [vmem:[#allocation2 + $0x1d0] sm:$0xf0] }
 0x11a   : > { %v327_v43 = vsel %vm326_vm1, %v3063_v32, %v325_v38  ;;  %332 = vst [vmem:[#allocation2 + $0x20] sm:$0xf] %v328_v39  ;;  %v345_v44 = vsel %vm344_vm5, %v338_v30, %v343_v42  ;;  %v2190_v33 = vld [vmem:[#allocation2 + $0x1c8] sm:$0xf]  ;;  %v877_v36 = vld [vmem:[%s3261_s2] sm:$0xff] }
 0x11b   : > { %331 = vst [vmem:[#allocation2 + $0x18] sm:$0xff] %v327_v43 }
 0x11c   : > { %349 = vst [vmem:[#allocation2 + $0x24] sm:$0xff] %v345_v44  ;;  %v939_v44 = vunpack.c.l.b16 %v877_v36 }
 0x11e   : > { %v574_v45 = vpop.permute.xlu1 %573  ;;  %v572_v40 = vpop.permute.xlu0 %571 }
 0x11f   : > { %v576_v29 = vrot.slane %v574_v45, 4  ;;  %v575_v46 = vrot.slane %v572_v40, 4  ;;  %v557_v47 = vpop.permute.xlu2 %556 }
 0x120   : > { %v559_v41 = vrot.slane %v557_v47, 4 }
 0x121   : > { %v579_v35 = vsel %vm434_vm6, %v574_v45, %v576_v29  ;;  %v577_v48 = vsel %vm306_vm0, %v575_v46, %v576_v29  ;;  %v2094_v29 = vld [vmem:[#allocation2 + $0x108] sm:$0xf]  ;;  %v2276_v46 = vld [vmem:[#allocation2 + $0x110] sm:$0xf0] }
 0x122   : > { %583 = vst [vmem:[#allocation2 + $0xe0] sm:$0xf] %v579_v35  ;;  %v578_v49 = vsel %vm434_vm6, %v572_v40, %v577_v48  ;;  %v1851_v50 = vld [vmem:[#allocation2 + $0x18] sm:$0xf]  ;;  %v2215_v32 = vld [vmem:[#allocation2 + $0x1c] sm:$0xf]  ;;  %v562_v51 = vsel %vm416_vm8, %v557_v47, %v559_v41  ;;  %v2107_v47 = vor.u32 %v2279_v26, %v2106_v31  ;;  %v3151_v48 = vpack.c.b16 %v939_v44, %v939_v44 }
 0x123   : > { %582 = vst [vmem:[#allocation2 + $0xd8] sm:$0xff] %v578_v49  ;;  %v2216_v52 = vld [vmem:[#allocation2 + $0x20] sm:$0xf0]  ;;  %v1853_v53 = vld [vmem:[#allocation2 + $0x24] sm:$0xf0] }
 0x124   : > { %v1852_v54 = vor.u32 %v2216_v52, %v1851_v50  ;;  %v1856_v8 = vor.u32 %v2215_v32, %v1853_v53  ;;  %566 = vst [vmem:[#allocation2 + $0xd4] sm:$0xf] %v562_v51  ;;  %v1820_v49 = vld [vmem:[%s2827_s24 + $0x18] sm:$0xf]  ;;  %v1819_v50 = vld [vmem:[%s2827_s24 + $0x10] sm:$0xff]  ;;  %s2304_s24 = smul.u32 6, %s2598_s21 }
 0x125   : > { %732 = vst [vmem:[#allocation2 + $0x170] sm:$0xf] %v1820_v49  ;;  %s1652_s21 = scalar_lea.sflag [#allocation5], %s2816_s8 }
 0x126   : > { %1194 = vmatpush.bf16.msra.mxu0 %v1852_v54  ;;  %1220 = vmatpush.bf16.msra.mxu2 %v1856_v8  ;;  %v840_v56 = vpop.permute.xlu1 %839  ;;  %v825_v58 = vpop.permute.xlu0 %824  ;;  %731 = vst [vmem:[#allocation2 + $0x168] sm:$0xff] %v1819_v50  ;;  %v2095_v54 = vor.u32 %v2276_v46, %v2094_v29  ;;  %v2046_v50 = vld [vmem:[#allocation2 + $0xa8] sm:$0xf]  ;;  %s1664_s14 = sadd.s32 %s2305_s10, %s2304_s24 }
 0x127   : > { %v843_v59 = vrot.slane %v840_v56, 4  ;;  %v827_v60 = vrot.slane %v825_v58, 4  ;;  %s2208_s28 = sshll.u32 %s1664_s14, 3 }
 0x128   : > { %v3121_v63 = vpop.permute.xlu2 %805  ;;  %s1666_s5 = scalar_lea.hbm %s3285_s7, %s2208_s28 }
 0x129   : > { %v828_v1 = vsel %vm306_vm0, %v826_v55, %v827_v60  ;;  %v830_v2 = vsel %vm398_vm7, %v825_v58, %v827_v60  ;;  %v845_v4 = vsel %vm306_vm0, %v843_v59, %v844_v17  ;;  %v1931_v55 = vld [vmem:[#allocation2 + $0xb0] sm:$0xf]  ;;  %v2256_v58 = vld [vmem:[#allocation2 + $0x160] sm:$0xf0]  ;;  %s1669_s15 = sshll.u32 %s1666_s5, 4  ;;  %s1670_s15 = int_to_ptr.hbm [resolvable:$true] %s1669_s15 }
 0x12a   : > { %v829_v5 = vsel %vm398_vm7, %v3084_v0, %v828_v1  ;;  %834 = vst [vmem:[#allocation2 + $0x1b8] sm:$0xf] %v830_v2  ;;  %v846_v7 = vsel %vm416_vm8, %v840_v56, %v845_v4  ;;  %v1947_v6 = vld [vmem:[#allocation2 + $0xd8] sm:$0xf]  ;;  %v2239_v9 = vld [vmem:[#allocation2 + $0xdc] sm:$0xf]  ;;  %v940_v2 = vunpack.c.h.b16 %v877_v36 }
 0x12b   : > { %833 = vst [vmem:[#allocation2 + $0x1b0] sm:$0xff] %v829_v5  ;;  %v1948_v10 = vor.u32 %v2240_v61, %v1947_v6  ;;  %v1952_v12 = vor.u32 %v2239_v9, %v1949_v62  ;;  %v2235_v56 = vld [vmem:[#allocation2 + $0xb8] sm:$0xf0]  ;;  %v2015_v61 = vld [vmem:[#allocation2 + $0x158] sm:$0xf]  ;;  %s2502_s30 = sshra.s32 %s1670_s15, 4  ;;  %s2503_s30 = int_to_ptr.hbm [resolvable:$true] %s2502_s30 }
 0x12c   : > { %850 = vst [vmem:[#allocation2 + $0x1bc] sm:$0xff] %v846_v7  ;;  %v2082_v62 = vld [vmem:[#allocation2 + $0xf0] sm:$0xf]  ;;  %v2273_v1 = vld [vmem:[#allocation2 + $0xf8] sm:$0xf0]  ;;  %s2504_s29 = scalar_lea.hbm %s2503_s30, 48  ;;  %p2509_p0 = scmp.lt.s32.totalorder %s2503_s30, %s3285_s7 }
 0x12d   : > { %1207 = vmatpush.bf16.msra.mxu1 %v1948_v10  ;;  %1233 = vmatpush.bf16.msra.mxu3 %v1952_v12  ;;  %p2505_p2 = scmp.ne.s32.totalorder %s2503_s30, %s2504_s29  ;;  %p2510_p4 = scmp.lt.s32.totalorder %s2508_s12, %s2504_s29 }
 0x12e   : > { %v303_v15 = vpop.permute.xlu1 %302  ;;  %v301_v16 = vpop.permute.xlu0 %300 }
 0x12f   : > { %v305_v11 = vrot.slane %v303_v15, 4  ;;  %v304_v13 = vrot.slane %v301_v16, 4  ;;  %p2506_p6 = pnand %p2505_p2, %p2758_p11  ;;  %p2511_p5 = por %p2510_p4, %p2509_p0 }
 0x131   : > { %v310_v17 = vsel %vm308_vm2, %v303_v15, %v305_v11  ;;  %v307_v14 = vsel %vm306_vm0, %v304_v13, %v305_v11  ;;  %v3133_v0 = vpop.permute.xlu2 %756  ;;  %v809_v15 = vrot.slane %v3121_v63, 4  ;;  %v2016_v11 = vor.u32 %v2256_v58, %v2015_v61  ;;  %v2232_v13 = vld [vmem:[#allocation2 + $0xa0] sm:$0xf0]  ;;  %p2507_p7 = pneg %p2506_p6 }
 0x132   : > { %314 = vst [vmem:[#allocation2 + $0x14] sm:$0xf] %v310_v17  ;;  %v309_v18 = vsel %vm308_vm2, %v301_v16, %v307_v14  ;;  %v759_v57 = vrot.slane %v3133_v0, 4  ;;  %v2178_v35 = vld [vmem:[#allocation2 + $0x1b0] sm:$0xf]  ;;  %v1932_v16 = vor.u32 %v2235_v56, %v1931_v55  ;;  %v3161_v14 = vpack.c.b16 %v940_v2, %v940_v2 }
 0x133   : > { %313 = vst [vmem:[#allocation2 + $0xc] sm:$0xff] %v309_v18  ;;  %v2253_v17 = vld [vmem:[#allocation2 + $0x148] sm:$0xf0]  ;;  %v1967_v55 = vld [vmem:[#allocation2 + $0xf8] sm:$0xf]  ;;  %p2512_p3 = pnand %p2511_p5, %p2507_p7 }
 0x134   : > { %v762_v3 = vsel %vm326_vm1, %v3133_v0, %v759_v57  ;;  %v2244_v56 = vld [vmem:[#allocation2 + $0x100] sm:$0xf0]  ;;  %v2261_v2 = vld [vmem:[#allocation2 + $0x98] sm:$0xf0] }
 0x135   : > { %766 = vst [vmem:[#allocation2 + $0x188] sm:$0xf] %v762_v3 }
 0x136   : > { %v555_v20 = vpop.permute.xlu1 %554  ;;  %v540_v21 = vpop.permute.xlu0 %539 }
 0x137   : > { %v558_v22 = vrot.slane %v555_v20, 4  ;;  %v542_v23 = vrot.slane %v540_v21, 4 }
 0x139   : > { %v560_v27 = vsel %vm306_vm0, %v558_v22, %v559_v41  ;;  %v543_v28 = vsel %vm306_vm0, %v541_v19, %v542_v23  ;;  %v545_v30 = vsel %vm398_vm7, %v540_v21, %v542_v23  ;;  %v2191_v41 = vor.u32 %v2300_v34, %v2190_v33  ;;  %v2003_v21 = vld [vmem:[#allocation2 + $0x140] sm:$0xf]  ;;  %v2229_v33 = vld [vmem:[#allocation2 + $0x88] sm:$0xf0] }
 0x13a   : > { %v561_v38 = vsel %vm416_vm8, %v555_v20, %v560_v27  ;;  %v544_v39 = vsel %vm398_vm7, %v3106_v37, %v543_v28  ;;  %549 = vst [vmem:[#allocation2 + $0xc8] sm:$0xf] %v545_v30  ;;  %v2213_v42 = vld [vmem:[#allocation2 + $0x8] sm:$0xf0]  ;;  %v1841_v43 = vld [vmem:[#allocation2 + $0xc] sm:$0xf0]  ;;  %v2083_v19 = vor.u32 %v2273_v1, %v2082_v62  ;;  %v2004_v27 = vor.u32 %v2253_v17, %v2003_v21  ;;  %v738_v62 = vpop.permute.xlu2 %737 }
 0x13b   : > { %565 = vst [vmem:[#allocation2 + $0xcc] sm:$0xff] %v561_v38  ;;  %v1840_v45 = vor.u32 %v2213_v42, %v1839_v24  ;;  %v1844_v40 = vor.u32 %v2212_v25, %v1841_v43  ;;  %v2297_v37 = vld [vmem:[#allocation2 + $0x1b8] sm:$0xf0]  ;;  %v1919_v20 = vld [vmem:[#allocation2 + $0x98] sm:$0xf] }
 0x13c   : > { %548 = vst [vmem:[#allocation2 + $0xc0] sm:$0xff] %v544_v39  ;;  %v2179_v8 = vor.u32 %v2297_v37, %v2178_v35  ;;  %v2070_v24 = vld [vmem:[#allocation2 + $0xd8] sm:$0xf]  ;;  %v2270_v25 = vld [vmem:[#allocation2 + $0xe0] sm:$0xf0]  ;;  %v1920_v26 = vor.u32 %v2232_v13, %v1919_v20 }
 0x13d   : > { %1195 = vmatpush.bf16.msra.mxu0 %v1840_v45  ;;  %1221 = vmatpush.bf16.msra.mxu2 %v1844_v40  ;;  %v2071_v38 = vor.u32 %v2270_v25, %v2070_v24  ;;  %v1907_v39 = vld [vmem:[#allocation2 + $0x80] sm:$0xf]  ;;  %v2250_v42 = vld [vmem:[#allocation2 + $0x130] sm:$0xf0]  ;;  %v1991_v43 = vld [vmem:[#allocation2 + $0x128] sm:$0xf] }
 0x13e   : > { %v791_v32 = vpop.permute.xlu1 %790  ;;  %v789_v51 = vpop.permute.xlu0 %788  ;;  %v1908_v44 = vor.u32 %v2229_v33, %v1907_v39  ;;  %v1992_v45 = vor.u32 %v2250_v42, %v1991_v43  ;;  %v1895_v40 = vld [vmem:[#allocation2 + $0x68] sm:$0xf]  ;;  %v2247_v35 = vld [vmem:[#allocation2 + $0x118] sm:$0xf0]  ;;  %v2241_v13 = vld [vmem:[#allocation2 + $0xe8] sm:$0xf0] }
 0x13f   : > { %v793_v52 = vrot.slane %v791_v32, 4  ;;  %v792_v53 = vrot.slane %v789_v51, 4  ;;  %v2198_v20 = vld [vmem:[#allocation2 + $0x1d0] sm:$0xf]  ;;  %v2217_v21 = vld [vmem:[#allocation2 + $0x28] sm:$0xf0] }
 0x140   : > { %1196 = vmatmul.bf16.vlgmr.msra.gmra.mxu0 %v3151_v48  ;;  %1222 = vmatmul.bf16.vlgmr.msra.gmra.mxu2 %v3151_v48  ;;  %v2108_v39 = vld [vmem:[#allocation2 + $0x12c] sm:$0xf0]  ;;  %v2186_v42 = vld [vmem:[#allocation2 + $0x1b8] sm:$0xf] }
 0x141   : > { %1569 = vmatpush.bf16.msrb.mxu0 %v2107_v47  ;;  %1583 = vmatpush.bf16.msrb.mxu2 %v2191_v41  ;;  %v796_v59 = vsel %vm362_vm4, %v791_v32, %v793_v52  ;;  %v794_v60 = vsel %vm306_vm0, %v792_v53, %v793_v52  ;;  %v2226_v47 = vld [vmem:[#allocation2 + $0x70] sm:$0xf0]  ;;  %v1979_v41 = vld [vmem:[#allocation2 + $0x110] sm:$0xf] }
 0x142   : > { %800 = vst [vmem:[#allocation2 + $0x1a0] sm:$0xf] %v796_v59  ;;  %v795_v4 = vsel %vm362_vm4, %v789_v51, %v794_v60  ;;  %v2237_v5 = vld [vmem:[#allocation2 + $0xc8] sm:$0xf0]  ;;  %v1937_v7 = vld [vmem:[#allocation2 + $0xcc] sm:$0xf0]  ;;  %v1896_v53 = vor.u32 %v2226_v47, %v1895_v40 }
 0x143   : > { %799 = vst [vmem:[#allocation2 + $0x198] sm:$0xff] %v795_v4  ;;  %v1935_v6 = vld [vmem:[#allocation2 + $0xc0] sm:$0xf]  ;;  %v2236_v9 = vld [vmem:[#allocation2 + $0xc4] sm:$0xf] }
 0x144   : > { %v1936_v10 = vor.u32 %v2237_v5, %v1935_v6  ;;  %v1940_v12 = vor.u32 %v2236_v9, %v1937_v7  ;;  %v2058_v0 = vld [vmem:[#allocation2 + $0xc0] sm:$0xf]  ;;  %v2264_v32 = vld [vmem:[#allocation2 + $0xb0] sm:$0xf0]  ;;  %v1883_v4 = vld [vmem:[#allocation2 + $0x50] sm:$0xf]  ;;  %v1968_v6 = vor.u32 %v2244_v56, %v1967_v55 }
 0x145   : > { %1570 = vmatpush.bf16.msrb.mxu0 %v2095_v54  ;;  %1584 = vmatpush.bf16.msrb.mxu2 %v2179_v8  ;;  %v1980_v54 = vor.u32 %v2247_v35, %v1979_v41  ;;  %v2223_v8 = vld [vmem:[#allocation2 + $0x58] sm:$0xf0]  ;;  %v2047_v59 = vor.u32 %v2264_v32, %v2046_v50  ;;  %v741_v5 = vrot.slane %v738_v62, 4  ;;  %v2034_v9 = vld [vmem:[#allocation2 + $0x90] sm:$0xf] }
 0x146   : > { %1208 = vmatpush.bf16.msra.mxu1 %v1936_v10  ;;  %1234 = vmatpush.bf16.msra.mxu3 %v1940_v12  ;;  %v755_v18 = vpop.permute.xlu1 %754  ;;  %v808_v3 = vpop.permute.xlu0 %807  ;;  %v1884_v7 = vor.u32 %v2223_v8, %v1883_v4  ;;  %v2022_v10 = vld [vmem:[#allocation2 + $0x78] sm:$0xf]  ;;  %v2275_v41 = vld [vmem:[#allocation2 + $0x10c] sm:$0xf]  ;;  %v2142_v50 = vld [vmem:[#allocation2 + $0x168] sm:$0xf] }
 0x147   : > { %v758_v22 = vrot.slane %v755_v18, 4  ;;  %v810_v23 = vrot.slane %v808_v3, 4  ;;  %v2096_v35 = vld [vmem:[#allocation2 + $0x114] sm:$0xf0]  ;;  %v2272_v8 = vld [vmem:[#allocation2 + $0xf4] sm:$0xf] }
 0x149   : > { %1571 = vmatpush.bf16.msrb.mxu0 %v2083_v19  ;;  %v811_v28 = vsel %vm306_vm0, %v809_v15, %v810_v23  ;;  %v813_v30 = vsel %vm380_vm3, %v808_v3, %v810_v23  ;;  %v760_v31 = vsel %vm306_vm0, %v758_v22, %v759_v57  ;;  %2018 = vmatmul.msk.bf16.vlgmr.msra.gmra.mxu3 %vm1184_vm9, %v3161_v14  ;;  %v2267_v57 = vld [vmem:[#allocation2 + $0xc8] sm:$0xf0]  ;;  %v2301_v3 = vld [vmem:[#allocation2 + $0x1d8] sm:$0xf0]  ;;  %v1871_v19 = vld [vmem:[#allocation2 + $0x38] sm:$0xf] }
 0x14a   : > { %1240 = vmatpush.bf16.msrb.mxu1 %v1932_v16  ;;  %1254 = vmatpush.bf16.msrb.mxu3 %v2016_v11  ;;  %v812_v34 = vsel %vm380_vm3, %v3121_v63, %v811_v28  ;;  %817 = vst [vmem:[#allocation2 + $0x1ac] sm:$0xf] %v813_v30  ;;  %v761_v36 = vsel %vm326_vm1, %v755_v18, %v760_v31  ;;  %v2166_v60 = vld [vmem:[#allocation2 + $0x198] sm:$0xf]  ;;  %v2220_v16 = vld [vmem:[#allocation2 + $0x40] sm:$0xf0] }
 0x14b   : > { %2017 = vmatmul.msk.bf16.vlgmr.msra.gmra.mxu1 %vm1184_vm9, %v3161_v14  ;;  %816 = vst [vmem:[#allocation2 + $0x1a4] sm:$0xff] %v812_v34  ;;  %v2059_v63 = vor.u32 %v2267_v57, %v2058_v0  ;;  %v2035_v15 = vor.u32 %v2261_v2, %v2034_v9  ;;  %v1955_v11 = vld [vmem:[#allocation2 + $0xe0] sm:$0xf]  ;;  %v2258_v18 = vld [vmem:[#allocation2 + $0x80] sm:$0xf0]  ;;  %v1872_v24 = vor.u32 %v2220_v16, %v1871_v19 }
 0x14c   : > { %765 = vst [vmem:[#allocation2 + $0x180] sm:$0xff] %v761_v36  ;;  %v1956_v25 = vor.u32 %v2241_v13, %v1955_v11  ;;  %v2238_v28 = vld [vmem:[#allocation2 + $0xd0] sm:$0xf0]  ;;  %v2023_v31 = vor.u32 %v2258_v18, %v2022_v10  ;;  %v2199_v36 = vor.u32 %v2301_v3, %v2198_v20  ;;  %v2298_v0 = vld [vmem:[#allocation2 + $0x1c0] sm:$0xf0] }
 0x14d   : > { %1572 = vmatpush.bf16.msrb.mxu0 %v2071_v38  ;;  %v871_v57 = vld [vmem:[%s3262_s3] sm:$0xff]  ;;  %v2187_v47 = vor.u32 %v2298_v0, %v2186_v42  ;;  %v2269_v9 = vld [vmem:[#allocation2 + $0xdc] sm:$0xf]  ;;  %v2072_v10 = vld [vmem:[#allocation2 + $0xe4] sm:$0xf0] }
 0x14e   : > { %1241 = vmatpush.bf16.msrb.mxu1 %v1920_v26  ;;  %1255 = vmatpush.bf16.msrb.mxu3 %v2004_v27  ;;  %v774_v29 = vpop.permute.xlu1 %773  ;;  %v772_v46 = vpop.permute.xlu0 %771  ;;  %v1859_v26 = vld [vmem:[#allocation2 + $0x20] sm:$0xf]  ;;  %v1943_v27 = vld [vmem:[#allocation2 + $0xc8] sm:$0xf]  ;;  %v2282_v11 = vld [vmem:[#allocation2 + $0x140] sm:$0xf0]  ;;  %v2075_v18 = vor.u32 %v2269_v9, %v2072_v10 }
 0x14f   : > { %v776_v49 = vrot.slane %v774_v29, 4  ;;  %v775_v37 = vrot.slane %v772_v46, 4  ;;  %v1860_v43 = vor.u32 %v2217_v21, %v1859_v26  ;;  %874 = vperm.xlu1 %2426, %v871_v57   ;;  %v2293_v13 = vld [vmem:[#allocation2 + $0x19c] sm:$0xf]  ;;  %v2118_v19 = vld [vmem:[#allocation2 + $0x138] sm:$0xf] }
 0x150   : > { %v2114_v20 = vld [vmem:[#allocation2 + $0x128] sm:$0xf]  ;;  %v2048_v42 = vld [vmem:[#allocation2 + $0xb4] sm:$0xf0]  ;;  %v2287_v0 = vld [vmem:[#allocation2 + $0x16c] sm:$0xf] }
 0x151   : > { %1573 = vmatpush.bf16.msrb.mxu0 %v2059_v63  ;;  %v779_v51 = vsel %vm344_vm5, %v774_v29, %v776_v49  ;;  %v777_v52 = vsel %vm306_vm0, %v775_v37, %v776_v49  ;;  %v1847_v29 = vld [vmem:[#allocation2 + $0x8] sm:$0xf]  ;;  %v2192_v63 = vld [vmem:[#allocation2 + $0x1d4] sm:$0xf0]  ;;  %v2299_v49 = vld [vmem:[#allocation2 + $0x1cc] sm:$0xf] }
 0x152   : > { %1242 = vmatpush.bf16.msrb.mxu1 %v1908_v44  ;;  %1256 = vmatpush.bf16.msrb.mxu3 %v1992_v45  ;;  %783 = vst [vmem:[#allocation2 + $0x194] sm:$0xf] %v779_v51  ;;  %v778_v58 = vsel %vm344_vm5, %v772_v46, %v777_v52  ;;  %v2294_v61 = vld [vmem:[#allocation2 + $0x1a0] sm:$0xf0]  ;;  %v1944_v44 = vor.u32 %v2238_v28, %v1943_v27  ;;  %v2214_v46 = vld [vmem:[#allocation2 + $0x10] sm:$0xf0] }
 0x153   : > { %782 = vst [vmem:[#allocation2 + $0x18c] sm:$0xff] %v778_v58  ;;  %v2167_v1 = vor.u32 %v2294_v61, %v2166_v60  ;;  %v2154_v33 = vld [vmem:[#allocation2 + $0x180] sm:$0xf]  ;;  %v2278_v45 = vld [vmem:[#allocation2 + $0x124] sm:$0xf]  ;;  %v1848_v32 = vor.u32 %v2214_v46, %v1847_v29  ;;  %v2099_v51 = vor.u32 %v2275_v41, %v2096_v35  ;;  %v2195_v52 = vor.u32 %v2299_v49, %v2192_v63 }
 0x154   : > { %v2111_v40 = vor.u32 %v2278_v45, %v2108_v39  ;;  %v2295_v37 = vld [vmem:[#allocation2 + $0x1a8] sm:$0xf0]  ;;  %v2084_v58 = vld [vmem:[#allocation2 + $0xfc] sm:$0xf0]  ;;  %v2138_v27 = vld [vmem:[#allocation2 + $0x158] sm:$0xf] }
 0x155   : > { %1574 = vmatpush.bf16.msrb.mxu0 %v2047_v59  ;;  %1585 = vmatpush.bf16.msrb.mxu2 %v2167_v1  ;;  %v2296_v59 = vld [vmem:[#allocation2 + $0x1b4] sm:$0xf]  ;;  %v2180_v60 = vld [vmem:[#allocation2 + $0x1bc] sm:$0xf0]  ;;  %v2285_v1 = vld [vmem:[#allocation2 + $0x158] sm:$0xf0]  ;;  %v2087_v2 = vor.u32 %v2272_v8, %v2084_v58 }
 0x156   : > { %1243 = vmatpush.bf16.msrb.mxu1 %v1896_v53  ;;  %1257 = vmatpush.bf16.msrb.mxu3 %v1980_v54  ;;  %v740_v12 = vpop.permute.xlu0 %739  ;;  %v2174_v53 = vld [vmem:[#allocation2 + $0x1a0] sm:$0xf]  ;;  %v2183_v4 = vor.u32 %v2296_v59, %v2180_v60  ;;  %v2286_v28 = vld [vmem:[#allocation2 + $0x160] sm:$0xf0]  ;;  %v2090_v45 = vld [vmem:[#allocation2 + $0xf8] sm:$0xf] }
 0x157   : > { %v742_v17 = vrot.slane %v740_v12, 4  ;;  %v2175_v55 = vor.u32 %v2295_v37, %v2174_v53  ;;  %v2139_v39 = vor.u32 %v2286_v28, %v2138_v27  ;;  %v2126_v63 = vld [vmem:[#allocation2 + $0x140] sm:$0xf]  ;;  %v2284_v35 = vld [vmem:[#allocation2 + $0x154] sm:$0xf] }
 0x158   : > { %v2036_v41 = vld [vmem:[#allocation2 + $0x9c] sm:$0xf0]  ;;  %v2024_v8 = vld [vmem:[#allocation2 + $0x84] sm:$0xf0]  ;;  %v2281_v58 = vld [vmem:[#allocation2 + $0x13c] sm:$0xf] }
 0x159   : > { %1575 = vmatpush.bf16.msrb.mxu0 %v2035_v15  ;;  %v743_v22 = vsel %vm306_vm0, %v741_v5, %v742_v17  ;;  %v745_v23 = vsel %vm308_vm2, %v740_v12, %v742_v17  ;;  %v2292_v61 = vld [vmem:[#allocation2 + $0x190] sm:$0xf0]  ;;  %v2162_v5 = vld [vmem:[#allocation2 + $0x188] sm:$0xf]  ;;  %v2150_v15 = vld [vmem:[#allocation2 + $0x170] sm:$0xf] }
 0x15a   : > { %1244 = vmatpush.bf16.msrb.mxu1 %v1884_v7  ;;  %1258 = vmatpush.bf16.msrb.mxu3 %v1968_v6  ;;  %v744_v30 = vsel %vm308_vm2, %v738_v62, %v743_v22  ;;  %749 = vst [vmem:[#allocation2 + $0x17c] sm:$0xf] %v745_v23  ;;  %v2291_v34 = vld [vmem:[#allocation2 + $0x188] sm:$0xf0]  ;;  %v2130_v62 = vld [vmem:[#allocation2 + $0x150] sm:$0xf]  ;;  %v2163_v7 = vor.u32 %v2292_v61, %v2162_v5 }
 0x15b   : > { %748 = vst [vmem:[#allocation2 + $0x174] sm:$0xff] %v744_v30  ;;  %v2155_v38 = vor.u32 %v2291_v34, %v2154_v33  ;;  %v2131_v6 = vor.u32 %v2285_v1, %v2130_v62  ;;  %v2168_v12 = vld [vmem:[#allocation2 + $0x1a4] sm:$0xf0]  ;;  %v2280_v17 = vld [vmem:[#allocation2 + $0x130] sm:$0xf0]  ;;  %v2119_v22 = vor.u32 %v2282_v11, %v2118_v19 }
 0x15c   : > { %v2171_v3 = vor.u32 %v2293_v13, %v2168_v12  ;;  %v2266_v23 = vld [vmem:[#allocation2 + $0xc4] sm:$0xf]  ;;  %v2115_v26 = vor.u32 %v2280_v17, %v2114_v20  ;;  %v2277_v33 = vld [vmem:[#allocation2 + $0x118] sm:$0xf0]  ;;  %v2132_v49 = vld [vmem:[#allocation2 + $0x15c] sm:$0xf0] }
 0x15d   : > { %1576 = vmatpush.bf16.msrb.mxu0 %v2023_v31  ;;  %1586 = vmatpush.bf16.msrb.mxu2 %v2155_v38  ;;  %v2290_v30 = vld [vmem:[#allocation2 + $0x184] sm:$0xf]  ;;  %v2102_v31 = vld [vmem:[#allocation2 + $0x110] sm:$0xf]  ;;  %v2263_v38 = vld [vmem:[#allocation2 + $0xac] sm:$0xf]  ;;  %v2135_v53 = vor.u32 %v2284_v35, %v2132_v49 }
 0x15e   : > { %1245 = vmatpush.bf16.msrb.mxu1 %v1872_v24  ;;  %1259 = vmatpush.bf16.msrb.mxu3 %v1956_v25  ;;  %v2060_v24 = vld [vmem:[#allocation2 + $0xcc] sm:$0xf0]  ;;  %v2051_v29 = vor.u32 %v2263_v38, %v2048_v42  ;;  %v2066_v59 = vld [vmem:[#allocation2 + $0xc8] sm:$0xf]  ;;  %v2268_v60 = vld [vmem:[#allocation2 + $0xd0] sm:$0xf0] }
 0x15f   : > { %v2156_v25 = vld [vmem:[#allocation2 + $0x18c] sm:$0xf0]  ;;  %v2063_v34 = vor.u32 %v2266_v23, %v2060_v24  ;;  %v2067_v1 = vor.u32 %v2268_v60, %v2066_v59  ;;  %v2030_v10 = vld [vmem:[#allocation2 + $0x80] sm:$0xf]  ;;  %v2259_v12 = vld [vmem:[#allocation2 + $0x88] sm:$0xf0] }
 0x160   : > { %1577 = vmatmul.bf16.vlgmr.msrb.gmra.mxu0 %v3151_v48 }
 0x161   : > { %1635 = vmatpush.bf16.msra.mxu0 %v2199_v36  ;;  %v2289_v16 = vld [vmem:[#allocation2 + $0x178] sm:$0xf0]  ;;  %v2159_v36 = vor.u32 %v2290_v30, %v2156_v25 }
 0x162   : > { %1246 = vmatpush.bf16.msrb.mxu1 %v1860_v43  ;;  %1260 = vmatpush.bf16.msrb.mxu3 %v1944_v44  ;;  %v2288_v54 = vld [vmem:[#allocation2 + $0x170] sm:$0xf0]  ;;  %v2151_v21 = vor.u32 %v2289_v16, %v2150_v15  ;;  %v2144_v57 = vld [vmem:[#allocation2 + $0x174] sm:$0xf0]  ;;  %v2103_v43 = vor.u32 %v2277_v33, %v2102_v31  ;;  %v2283_v44 = vld [vmem:[#allocation2 + $0x148] sm:$0xf0]  ;;  %v2031_v15 = vor.u32 %v2259_v12, %v2030_v10 }
 0x163   : > { %v2143_v56 = vor.u32 %v2288_v54, %v2142_v50  ;;  %v2147_v46 = vor.u32 %v2287_v0, %v2144_v57  ;;  %v2260_v50 = vld [vmem:[#allocation2 + $0x94] sm:$0xf]  ;;  %v2257_v54 = vld [vmem:[#allocation2 + $0x7c] sm:$0xf] }
 0x164   : > { %v2027_v61 = vor.u32 %v2257_v54, %v2024_v8 }
 0x165   : > { %1636 = vmatpush.bf16.msra.mxu0 %v2187_v47  ;;  %2019 = vmatmul.msk.bf16.vlgmr.msrb.gmra.mxu3 %vm1184_vm9, %v3161_v14  ;;  %v2127_v47 = vor.u32 %v2283_v44, %v2126_v63 }
 0x166   : > { %1595 = vmatpush.bf16.msra.mxu3 %v2111_v40  ;;  %1247 = vmatpush.bf16.msrb.mxu1 %v1848_v32  ;;  %v2274_v40 = vld [vmem:[#allocation2 + $0x100] sm:$0xf0]  ;;  %v2078_v32 = vld [vmem:[#allocation2 + $0xe0] sm:$0xf] }
 0x167   : > { %1587 = vmatpush.bf16.msrb.mxu2 %v2143_v56  ;;  %v2091_v37 = vor.u32 %v2274_v40, %v2090_v45 }
 0x169   : > { %1637 = vmatpush.bf16.msra.mxu0 %v2175_v55  ;;  %1248 = vmatmul.bf16.vlgmr.msrb.gmra.mxu1 %v3151_v48  ;;  %v2120_v55 = vld [vmem:[#allocation2 + $0x144] sm:$0xf0] }
 0x16a   : > { %1596 = vmatpush.bf16.msra.mxu3 %v2099_v51  ;;  %1609 = vmatpush.bf16.msra.mxu1 %v2195_v52  ;;  %v2271_v51 = vld [vmem:[#allocation2 + $0xe8] sm:$0xf0]  ;;  %v2039_v52 = vor.u32 %v2260_v50, %v2036_v41  ;;  %v2123_v62 = vor.u32 %v2281_v58, %v2120_v55 }
 0x16b   : > { %1588 = vmatpush.bf16.msrb.mxu2 %v2131_v6  ;;  %v2079_v56 = vor.u32 %v2271_v51, %v2078_v32  ;;  %v2042_v6 = vld [vmem:[#allocation2 + $0x98] sm:$0xf] }
 0x16d   : > { %1638 = vmatpush.bf16.msra.mxu0 %v2163_v7  ;;  %v2262_v7 = vld [vmem:[#allocation2 + $0xa0] sm:$0xf0] }
 0x16e   : > { %1597 = vmatpush.bf16.msra.mxu3 %v2087_v2  ;;  %1610 = vmatpush.bf16.msra.mxu1 %v2183_v4  ;;  %v2054_v2 = vld [vmem:[#allocation2 + $0xb0] sm:$0xf]  ;;  %v2265_v4 = vld [vmem:[#allocation2 + $0xb8] sm:$0xf0]  ;;  %v2043_v9 = vor.u32 %v2262_v7, %v2042_v6 }
 0x16f   : > { %1589 = vmatpush.bf16.msrb.mxu2 %v2119_v22  ;;  %v2055_v5 = vor.u32 %v2265_v4, %v2054_v2 }
 0x171   : > { %1639 = vmatpush.bf16.msra.mxu0 %v2151_v21 }
 0x172   : > { %1598 = vmatpush.bf16.msra.mxu3 %v2075_v18  ;;  %1611 = vmatpush.bf16.msra.mxu1 %v2171_v3 }
 0x173   : > { %1621 = vmatpush.bf16.msra.mxu2 %v2115_v26 }
 0x174   : > { %2200 = vmatmul.msk.bf16.vlgmr.msrb.gmra.mxu2 %vm1184_vm9, %v3161_v14 }
 0x175   : > { %1640 = vmatpush.bf16.msra.mxu0 %v2139_v39 }
 0x176   : > { %1599 = vmatpush.bf16.msra.mxu3 %v2063_v34  ;;  %1612 = vmatpush.bf16.msra.mxu1 %v2159_v36 }
 0x177   : > { %1622 = vmatpush.bf16.msra.mxu2 %v2103_v43 }
 0x179   : > { %1641 = vmatpush.bf16.msra.mxu0 %v2127_v47 }
 0x17a   : > { %1600 = vmatpush.bf16.msra.mxu3 %v2051_v29  ;;  %1613 = vmatpush.bf16.msra.mxu1 %v2147_v46 }
 0x17b   : > { %1623 = vmatpush.bf16.msra.mxu2 %v2091_v37 }
 0x17c   : > { %2202 = vmatmul.msk.bf16.vlgmr.msra.gmra.mxu0 %vm1184_vm9, %v3161_v14 }
 0x17e   : > { %1601 = vmatpush.bf16.msra.mxu3 %v2039_v52  ;;  %1614 = vmatpush.bf16.msra.mxu1 %v2135_v53 }
 0x17f   : > { %1624 = vmatpush.bf16.msra.mxu2 %v2079_v56 }
 0x182   : > { %1602 = vmatpush.bf16.msra.mxu3 %v2027_v61  ;;  %1615 = vmatpush.bf16.msra.mxu1 %v2123_v62 }
 0x183   : > { %1625 = vmatpush.bf16.msra.mxu2 %v2067_v1 }
 0x185   : > { %1603 = vmatmul.bf16.vlgmr.msra.gmra.mxu3 %v3151_v48  ;;  %2201 = vmatmul.msk.bf16.vlgmr.msra.gmra.mxu1 %vm1184_vm9, %v3161_v14 }
 0x187   : > { %1626 = vmatpush.bf16.msra.mxu2 %v2055_v5 }
 0x18b   : > { %1627 = vmatpush.bf16.msra.mxu2 %v2043_v9 }
 0x18f   : > { %1628 = vmatpush.bf16.msra.mxu2 %v2031_v15 }
 0x192   : > { %1629 = vmatmul.bf16.vlgmr.msra.gmra.mxu2 %v3151_v48 }
 0x1bd   : > { %v1197_v16 = vpop.f32.mrf.mxu0 }
 0x1c1   : > { %v875_v19 = vpop.permute.xlu1 %874 }
 0x1c2   : > { %v1198_v20 = vadd.f32 %v1197_v16, %v875_v19 }
 0x1c3   : > { %v1223_v11 = vpop.f32.mrf.mxu2 }
 0x1c4   : > { %v1224_v21 = vadd.f32 %v1223_v11, %v875_v19 }
 0x1c5   : > { %v1199_v13 = vpop.f32.mrf.mxu0 }
 0x1c8   : > { %v1210_v17 = vpop.f32.mrf.mxu1 }
 0x1c9   : > { %v1211_v22 = vadd.f32 %v1210_v17, %v1198_v20 }
 0x1cb   : > { %v1225_v18 = vpop.f32.mrf.mxu2  ;;  %1266 = vst [vmem:[%s3197_s22] sm:$0xff] %v1211_v22 }
 0x1cc   : > { %v1236_v3 = vpop.f32.mrf.mxu3 }
 0x1cd   : > { %v1237_v23 = vadd.f32 %v1236_v3, %v1224_v21 }
 0x1cf   : > { %1267 = vst [vmem:[%s3197_s22 + $0x8] sm:$0xff] %v1237_v23 }
 0x1d0   : > { %v1212_v14 = vpop.f32.mrf.mxu1 }
 0x1d4   : > { %v1238_v24 = vpop.f32.mrf.mxu3 }
 0x1dd   : > { %v1578_v48 = vpop.f32.mrf.mxu0 }
 0x1de   : > { %v1579_v34 = vadd.f32 %v1578_v48, %v875_v19 }
 0x1e5   : > { %v1580_v28 = vpop.f32.mrf.mxu0 }
 0x1e6   : > { %v1249_v25 = vpop.f32.mrf.mxu1 }
 0x1e7   : > { %v1250_v26 = vadd.f32 %v1249_v25, %v875_v19 }
 0x1e8   : > { %v1262_v27 = vpop.f32.mrf.mxu3 }
 0x1e9   : > { %v1263_v30 = vadd.f32 %v1262_v27, %v1250_v26 }
 0x1eb   : > { %1268 = vst [vmem:[%s3197_s22 + $0x10] sm:$0xff] %v1263_v30 }
 0x1ee   : > { %v1251_v31 = vpop.f32.mrf.mxu1 }
 0x1f0   : > { %v1264_v33 = vpop.f32.mrf.mxu3 }
 0x1f7   : > { %v1591_v36 = vpop.f32.mrf.mxu2 }
 0x1f8   : > { %v1592_v38 = vadd.f32 %v1591_v36, %v1579_v34 }
 0x1f9   : > { %v1643_v39 = vpop.f32.mrf.mxu0 }
 0x1fa   : > { %2203 = vst [vmem:[%s3197_s22 + $0x18] sm:$0xff] %v1592_v38 }
 0x1ff   : > { %v1593_v42 = vpop.f32.mrf.mxu2 }
 0x201   : > { %v1645_v57 = vpop.f32.mrf.mxu0 }
 0x202   : > { %v1617_v0 = vpop.f32.mrf.mxu1 }
 0x208   : > { %v1604_v43 = vpop.f32.mrf.mxu3 }
 0x209   : > { %v1605_v44 = vadd.f32 %v1604_v43, %v875_v19 }
 0x20a   : > { %v1619_v45 = vpop.f32.mrf.mxu1 }
 0x20b   : > { %v1618_v40 = vadd.f32 %v1617_v0, %v1605_v44 }
 0x20d   : > { %2204 = vst [vmem:[%s3197_s22 + $0x20] sm:$0xff] %v1618_v40 }
 0x210   : > { %v1606_v29 = vpop.f32.mrf.mxu3 }
 0x215   : > { %v1630_v46 = vpop.f32.mrf.mxu2 }
 0x216   : > { %v1631_v63 = vadd.f32 %v1630_v46, %v875_v19 }
 0x218   : > { %v1644_v47 = vadd.f32 %v1643_v39, %v1631_v63 }
 0x21a   : > { %2205 = vst [vmem:[%s3197_s22 + $0x28] sm:$0xff] %v1644_v47 }
 0x21b   : > { %2515 = shalt.err (!%p2512_p3)
}
 0x21c   : > { %s2627_s8 = smov 384   ;;  %s2628_s22 = smov 24  }
 0x21d   : > { %2310 = dma.vmem_to_hbm [thread:$0]  (%p2758_p11), %s1668_s9, 768, %s1670_s15, %s1652_s21, %s2627_s8, %s2627_s8, %s2628_s22   ;;  %v1632_v41 = vpop.f32.mrf.mxu2 }
 0x21e PF: > { %p2324_p8 = scmp.ge.s32.totalorder %s2614_s25, 2  ;;  %s1684_s14 = sand.u32 1, %s2586_s18  }
 0x21f   : > { %s1685_s28 = scalar_lea.sflag [#allocation5], %s1684_s14 }
 0x220   : > { %p2320_p9 = pnand %p2324_p8, %p2768_p13 }
 0x222   : > { %p2321_p12 = pneg %p2320_p9 }
 0x224   : > { %2569 = dma.done.wait (%p2321_p12), %s1685_s28, 768  }
 0x225   : > { %2571 = vsyncadd (%p2321_p12), %s1685_s28, 4294966528  ;;  %s23_s25 = sadd.s32 1, %s2614_s25   ;;  %s3286_s4 = sld [smem:[#allocation17_spill]] }
 0x226   : > { %p20_p1 = scmp.ge.s32.totalorder %s23_s25, 10   ;;  %s3287_s21 = sld [smem:[#allocation13_spill]] }
 0x227   : > { %s3288_s22 = sld [smem:[#allocation14_spill]]  ;;  %s3291_s15 = smov %s2578_s16 }
 0x228   : > { %s3289_s23 = sld [smem:[#allocation15_spill]]  ;;  %s3292_s16 = smov %s2582_s17 }
 0x229   : > { %s3290_s24 = sld [smem:[#allocation16_spill]]  ;;  %s3293_s17 = smov %s2793_s11 }
 0x22a   : > { %s3294_s18 = smov %s2590_s19  ;;  %s3295_s19 = smov %s2594_s20 }
 0x22b   : > { %s3296_s20 = smov %s3286_s4  ;;  %22 = sbr.rel (!%p20_p1) target bundleno = 13 (0xd), region = 97 }
 0x230   :  { %1691 = vsyncpa [#allocation4], 1 }
 0x231   :  { %1693 = vsyncpa [#allocation4 + $0x1], 1 }
 0x232   :  { %1694 = vsyncpa [#allocation7], 1 }
 0x233   :  { %1696 = vsyncpa [#allocation7 + $0x1], 1 }
 0x234   :  { %1697 = vsyncpa [#allocation5], 1 }
 0x235   :  { %1699 = vsyncpa [#allocation5 + $0x1], 1 }

</bundles_post_ra>
